<compile_context>
chip_gen: v5e
topology: v5e:2x2
jax: 0.10.0
libtpu: 0.0.40
codegen_flags: <defaults>
</compile_context>

<pallas_src>
import math
import functools

import jax
import jax.numpy as jnp
from jax import lax
from jax.experimental import pallas as pl
from jax.experimental.pallas import tpu as pltpu


def _round_up(v, m):
    return ((v + m - 1) // m) * m


def _geglu_conv_kernel(cur_ref, halo_ref, wh_ref, wg_ref, bh_ref, bg_ref,
                       o_ref, xcat_ref, *, K, L_TILE, C_out_p):
    # cur_ref : (1, L_TILE, C_in)   current tile of the padded input
    # halo_ref: (1, HALO,  C_in)    first HALO rows of the next tile
    # wh_ref  : (K, C_in, C_out_p)  per-tap weights, h half      (resident)
    # wg_ref  : (K, C_in, C_out_p)  per-tap weights, gate half   (resident)
    # bh_ref, bg_ref: (1, C_out_p)  f32 biases                   (resident)
    # o_ref   : (1, L_TILE, C_out_p)
    # xcat_ref: (L_TILE + HALO, C_in) VMEM scratch (contiguous shifted window)

    # Two full, sublane-aligned stores replace the K masked / lane-misaligned
    # im2col stores of the previous version.
    xcat_ref[:L_TILE, :] = cur_ref[0]
    xcat_ref[L_TILE:, :] = halo_ref[0]

    # K taps = K MXU dots on static sublane-shifted views, f32 accumulation.
    acc_h = bh_ref[...]
    acc_g = bg_ref[...]
    for t in range(K):
        xt = xcat_ref[t:t + L_TILE, :]
        acc_g = acc_g + jnp.dot(xt, wg_ref[t], preferred_element_type=jnp.float32)
        acc_h = acc_h + jnp.dot(xt, wh_ref[t], preferred_element_type=jnp.float32)

    # exact GELU (erf), matching torch.nn.functional.gelu default
    gelu_g = 0.5 * acc_g * (1.0 + lax.erf(acc_g * (1.0 / math.sqrt(2.0))))
    o_ref[0] = (acc_h * gelu_g).astype(o_ref.dtype)


def _vmem_capacity_bytes():
    try:
        return int(pltpu.get_tpu_info().vmem_capacity_bytes)
    except Exception:
        return 64 * 1024 * 1024  # conservative fallback (v7x per-TC size)


def conv1d_geglu(x_ncw, weight, bias, kernel_size, *, l_tile=None, mxu_dtype=None):
    """Conv1dGEGLU forward.

    x_ncw: (B, C_in, L); weight: (2*C_out, C_in, K); bias: (2*C_out,).
    mxu_dtype: matmul-operand dtype. None -> bfloat16 for f32 inputs (native
      MXU path, f32 accumulation); pass jnp.float32 to keep f32 operands
      (closest to the PyTorch f32 conv numerics).
    """
    B, C_in, L = x_ncw.shape
    two_cout, w_cin, K = weight.shape
    assert w_cin == C_in and K == kernel_size
    assert K % 2 == 1, "even kernel_size changes PyTorch output length; only odd K supported"
    C_out = two_cout // 2
    pad = K // 2
    out_dtype = x_ncw.dtype

    if mxu_dtype is None:
        op_dtype = jnp.bfloat16 if x_ncw.dtype == jnp.float32 else x_ncw.dtype
    else:
        op_dtype = jnp.dtype(mxu_dtype)
    op_isz = jnp.dtype(op_dtype).itemsize
    out_isz = jnp.dtype(out_dtype).itemsize

    # Halo: just enough next-tile rows to cover the K-1 tail taps (multiple of 8).
    HALO = max(8, _round_up(K - 1, 8))
    # Lane-dense output channels: pad each of the h / gate groups to 128.
    C_out_p = _round_up(C_out, 128)

    # Generation-aware tile size / VMEM budget.
    vmem_cap = _vmem_capacity_bytes()
    vmem_budget = int(0.8 * vmem_cap)            # headroom for compiler scratch
    if l_tile is None:
        l_tile = 512 if vmem_cap >= 96 * 1024 * 1024 else 256   # v5e/v6e vs v7x

    L_TILE = min(l_tile, _round_up(L, HALO))
    L_TILE = _round_up(max(L_TILE, HALO), HALO)

    def vmem_est(lt):
        return (2 * lt * C_in * op_isz                     # cur block (double-buffered)
                + 2 * HALO * C_in * op_isz                 # halo block (double-buffered)
                + 2 * 2 * K * C_in * C_out_p * op_isz      # wh + wg (<= 2 buffers)
                + 2 * 2 * C_out_p * 4                      # biases
                + 2 * lt * C_out_p * out_isz               # output block (double-buffered)
                + (lt + HALO) * C_in * op_isz              # xcat scratch
                + 4 * lt * C_out_p * 4)                    # f32 accumulators / epilogue

    while 2 * vmem_est(L_TILE) > vmem_budget and L_TILE > HALO:
        L_TILE = _round_up(max(HALO, L_TILE // 2), HALO)

    n_tiles = pl.cdiv(L, L_TILE)
    L_out_pad = n_tiles * L_TILE
    L_in_pad = n_tiles * L_TILE + HALO
    RATIO = L_TILE // HALO                       # HALO divides L_TILE by construction

    # ---- wrapper layout glue (NCW -> NLC, zero halo padding) -----------------
    # TODO(synk): keep activations channels-last (and bf16) across the model so
    # these transpose / pad / slice HBM passes disappear.
    x_nlc = jnp.transpose(x_ncw, (0, 2, 1)).astype(op_dtype)        # (B, L, C_in)
    x_pad = jnp.pad(x_nlc, ((0, 0), (pad, L_in_pad - L - pad), (0, 0)))

    # Per-tap weights, h / gate halves split, padded to lane-dense C_out_p.
    w_kic = jnp.transpose(weight, (2, 1, 0))                        # (K, C_in, 2*C_out)
    cpad = ((0, 0), (0, 0), (0, C_out_p - C_out))
    w_h = jnp.pad(w_kic[..., :C_out], cpad).astype(op_dtype)
    w_g = jnp.pad(w_kic[..., C_out:], cpad).astype(op_dtype)
    b_h = jnp.pad(bias[:C_out].astype(jnp.float32), (0, C_out_p - C_out)).reshape(1, C_out_p)
    b_g = jnp.pad(bias[C_out:].astype(jnp.float32), (0, C_out_p - C_out)).reshape(1, C_out_p)

    kernel = functools.partial(_geglu_conv_kernel, K=K, L_TILE=L_TILE, C_out_p=C_out_p)
    vmem_limit = int(min(vmem_budget, max(2 * vmem_est(L_TILE), 32 * 1024 * 1024)))

    def build(use_buffered):
        def resident(shape):
            kw = {"pipeline_mode": pl.Buffered(1)} if use_buffered else {}
            return pl.BlockSpec(shape, lambda b, l: (0,) * len(shape), **kw)

        return pl.pallas_call(
            kernel,
            out_shape=jax.ShapeDtypeStruct((B, L_out_pad, C_out_p), out_dtype),
            grid_spec=pltpu.PrefetchScalarGridSpec(
                num_scalar_prefetch=0,
                grid=(B, n_tiles),
                in_specs=[
                    pl.BlockSpec((1, L_TILE, C_in), lambda b, l: (b, l, 0)),       # current tile
                    pl.BlockSpec((1, HALO, C_in),
                                 lambda b, l: (b, (l + 1) * RATIO, 0)),            # halo rows only
                    resident((K, C_in, C_out_p)),                                  # W_h
                    resident((K, C_in, C_out_p)),                                  # W_gate
                    resident((1, C_out_p)),                                        # b_h
                    resident((1, C_out_p)),                                        # b_gate
                ],
                out_specs=pl.BlockSpec((1, L_TILE, C_out_p), lambda b, l: (b, l, 0)),
                scratch_shapes=[pltpu.VMEM((L_TILE + HALO, C_in), op_dtype)],
            ),
            compiler_params=pltpu.CompilerParams(
                dimension_semantics=("parallel", "parallel"),
                vmem_limit_bytes=vmem_limit,
            ),
        )

    try:
        out_pad = build(True)(x_pad, x_pad, w_h, w_g, b_h, b_g)
    except Exception:
        # pipeline_mode=pl.Buffered(1) not supported on this jax version:
        # fall back to default double-buffered resident weights.
        out_pad = build(False)(x_pad, x_pad, w_h, w_g, b_h, b_g)

    # Slice off L / channel padding (padded lanes are exactly zero) and return to NCW.
    return jnp.transpose(out_pad[:, :L, :C_out], (0, 2, 1))


def _reference(x_ncw, weight, bias, kernel_size):
    pad = kernel_size // 2
    y = lax.conv_general_dilated(
        x_ncw.astype(jnp.float32), weight.astype(jnp.float32),
        window_strides=(1,), padding=[(pad, pad)],
        dimension_numbers=("NCH", "OIH", "NCH"),
        precision=lax.Precision.HIGHEST,
    ) + bias.astype(jnp.float32)[None, :, None]
    two_cout = weight.shape[0]
    h, gate = y[:, : two_cout // 2], y[:, two_cout // 2:]
    return h * jax.nn.gelu(gate, approximate=False)


if __name__ == "__main__":
    B, dim_in, dim_out, L, K = 2, 8, 16, 50, 9

    key = jax.random.PRNGKey(0)
    kx, kw, kb = jax.random.split(key, 3)

    # Deterministic parameter init (shapes from nn.Conv1d(dim_in, 2*dim_out, K)).
    fan_in = dim_in * K
    bound = 1.0 / math.sqrt(fan_in)
    weight = jax.random.uniform(kw, (2 * dim_out, dim_in, K), jnp.float32,
                                minval=-bound, maxval=bound)
    bias = jax.random.uniform(kb, (2 * dim_out,), jnp.float32,
                              minval=-bound, maxval=bound)
    x = jax.random.normal(kx, (B, dim_in, L), jnp.float32)

    ref = _reference(x, weight, bias, K)

    # Default path: bf16 MXU operands, f32 accumulation.  Small tile forces
    # several grid steps so the halo indexing is exercised.
    out = jax.block_until_ready(conv1d_geglu(x, weight, bias, K, l_tile=16))
    assert out.shape == (B, dim_out, L)
    assert jnp.allclose(out, ref, atol=3e-2, rtol=3e-2), "bf16-operand path mismatch vs reference"

    # f32-operand path (closest to the PyTorch f32 conv), auto tile selection.
    out32 = jax.block_until_ready(conv1d_geglu(x, weight, bias, K, mxu_dtype=jnp.float32))
    assert out32.shape == (B, dim_out, L)
    assert jnp.allclose(out32, ref, atol=3e-2, rtol=3e-2), "f32-operand path mismatch vs reference"

    print("KERNEL_OK")
</pallas_src>

<mosaic_0001>
module attributes {stable_mosaic.version = 11 : i64} {
  func.func @_geglu_conv_kernel(%arg0: i32, %arg1: i32, %arg2: memref<1x16x8xbf16, #tpu.memory_space<vmem>>, %arg3: memref<1x8x8xbf16, #tpu.memory_space<vmem>>, %arg4: memref<9x8x128xbf16, #tpu.memory_space<vmem>>, %arg5: memref<9x8x128xbf16, #tpu.memory_space<vmem>>, %arg6: memref<1x128xf32, #tpu.memory_space<vmem>>, %arg7: memref<1x128xf32, #tpu.memory_space<vmem>>, %arg8: memref<1x16x128xf32, #tpu.memory_space<vmem>>, %arg9: memref<24x8xbf16, #tpu.memory_space<vmem>>) attributes {dimension_semantics = [#tpu.dimension_semantics<parallel>, #tpu.dimension_semantics<parallel>], iteration_bounds = array<i64: 2, 4>, scalar_prefetch = 0 : i64, scratch_operands = 1 : i64, tpu.core_type = #tpu.core_type<tc>, window_params = [{transform_indices = @transform_0, window_bounds = array<i64: 1, 16, 8>}, {transform_indices = @transform_1, window_bounds = array<i64: 1, 8, 8>}, {pipeline_mode = #tpu.pipeline_mode<synchronous>, transform_indices = @transform_2, window_bounds = array<i64: 9, 8, 128>}, {pipeline_mode = #tpu.pipeline_mode<synchronous>, transform_indices = @transform_3, window_bounds = array<i64: 9, 8, 128>}, {pipeline_mode = #tpu.pipeline_mode<synchronous>, transform_indices = @transform_4, window_bounds = array<i64: 1, 128>}, {pipeline_mode = #tpu.pipeline_mode<synchronous>, transform_indices = @transform_5, window_bounds = array<i64: 1, 128>}, {transform_indices = @transform_6, window_bounds = array<i64: 1, 16, 128>}]} {
    %c0 = arith.constant 0 : index
    %c0_0 = arith.constant 0 : index
    %c0_1 = arith.constant 0 : index
    %0 = vector.load %arg2[%c0, %c0_0, %c0_1] : memref<1x16x8xbf16, #tpu.memory_space<vmem>>, vector<1x16x8xbf16>
    %1 = vector.shape_cast %0 : vector<1x16x8xbf16> to vector<16x8xbf16>
    %c0_2 = arith.constant 0 : index
    %c0_3 = arith.constant 0 : index
    %2 = vector.load %arg9[%c0_2, %c0_3] : memref<24x8xbf16, #tpu.memory_space<vmem>>, vector<16x8xbf16>
    tpu.vector_store %arg9[%c0_2, %c0_3], %1 {strides = array<i32>} : memref<24x8xbf16, #tpu.memory_space<vmem>>, vector<16x8xbf16>,
    %c0_4 = arith.constant 0 : index
    %c0_5 = arith.constant 0 : index
    %c0_6 = arith.constant 0 : index
    %3 = vector.load %arg3[%c0_4, %c0_5, %c0_6] : memref<1x8x8xbf16, #tpu.memory_space<vmem>>, vector<1x8x8xbf16>
    %4 = vector.shape_cast %3 : vector<1x8x8xbf16> to vector<8x8xbf16>
    %c16 = arith.constant 16 : index
    %c0_7 = arith.constant 0 : index
    %5 = vector.load %arg9[%c16, %c0_7] : memref<24x8xbf16, #tpu.memory_space<vmem>>, vector<8x8xbf16>
    tpu.vector_store %arg9[%c16, %c0_7], %4 {strides = array<i32>} : memref<24x8xbf16, #tpu.memory_space<vmem>>, vector<8x8xbf16>,
    %c0_8 = arith.constant 0 : index
    %c0_9 = arith.constant 0 : index
    %6 = vector.load %arg6[%c0_8, %c0_9] : memref<1x128xf32, #tpu.memory_space<vmem>>, vector<1x128xf32>
    %c0_10 = arith.constant 0 : index
    %c0_11 = arith.constant 0 : index
    %7 = vector.load %arg7[%c0_10, %c0_11] : memref<1x128xf32, #tpu.memory_space<vmem>>, vector<1x128xf32>
    %c0_12 = arith.constant 0 : index
    %c0_13 = arith.constant 0 : index
    %8 = vector.load %arg9[%c0_12, %c0_13] : memref<24x8xbf16, #tpu.memory_space<vmem>>, vector<16x8xbf16>
    %c0_14 = arith.constant 0 : index
    %c0_15 = arith.constant 0 : index
    %c0_16 = arith.constant 0 : index
    %9 = vector.load %arg5[%c0_14, %c0_15, %c0_16] : memref<9x8x128xbf16, #tpu.memory_space<vmem>>, vector<1x8x128xbf16>
    %10 = vector.shape_cast %9 : vector<1x8x128xbf16> to vector<8x128xbf16>
    %cst = arith.constant dense<0.000000e+00> : vector<16x128xf32>
    %11 = tpu.matmul %8, %10, %cst {dimension_numbers = #tpu.dot_dimension_numbers<[1], [0], [0], [1], [0, 0, 1, 1], [], []>} : vector<16x8xbf16>, vector<8x128xbf16>, vector<16x128xf32> -> vector<16x128xf32>
    %12 = vector.broadcast %7 : vector<1x128xf32> to vector<16x128xf32>
    %13 = arith.addf %12, %11 : vector<16x128xf32>
    %c0_17 = arith.constant 0 : index
    %c0_18 = arith.constant 0 : index
    %c0_19 = arith.constant 0 : index
    %14 = vector.load %arg4[%c0_17, %c0_18, %c0_19] : memref<9x8x128xbf16, #tpu.memory_space<vmem>>, vector<1x8x128xbf16>
    %15 = vector.shape_cast %14 : vector<1x8x128xbf16> to vector<8x128xbf16>
    %cst_20 = arith.constant dense<0.000000e+00> : vector<16x128xf32>
    %16 = tpu.matmul %8, %15, %cst_20 {dimension_numbers = #tpu.dot_dimension_numbers<[1], [0], [0], [1], [0, 0, 1, 1], [], []>} : vector<16x8xbf16>, vector<8x128xbf16>, vector<16x128xf32> -> vector<16x128xf32>
    %17 = vector.broadcast %6 : vector<1x128xf32> to vector<16x128xf32>
    %18 = arith.addf %17, %16 : vector<16x128xf32>
    %c1 = arith.constant 1 : index
    %c0_21 = arith.constant 0 : index
    %19 = vector.load %arg9[%c1, %c0_21] : memref<24x8xbf16, #tpu.memory_space<vmem>>, vector<16x8xbf16>
    %c1_22 = arith.constant 1 : index
    %c0_23 = arith.constant 0 : index
    %c0_24 = arith.constant 0 : index
    %20 = vector.load %arg5[%c1_22, %c0_23, %c0_24] : memref<9x8x128xbf16, #tpu.memory_space<vmem>>, vector<1x8x128xbf16>
    %21 = vector.shape_cast %20 : vector<1x8x128xbf16> to vector<8x128xbf16>
    %cst_25 = arith.constant dense<0.000000e+00> : vector<16x128xf32>
    %22 = tpu.matmul %19, %21, %cst_25 {dimension_numbers = #tpu.dot_dimension_numbers<[1], [0], [0], [1], [0, 0, 1, 1], [], []>} : vector<16x8xbf16>, vector<8x128xbf16>, vector<16x128xf32> -> vector<16x128xf32>
    %23 = arith.addf %13, %22 : vector<16x128xf32>
    %c1_26 = arith.constant 1 : index
    %c0_27 = arith.constant 0 : index
    %c0_28 = arith.constant 0 : index
    %24 = vector.load %arg4[%c1_26, %c0_27, %c0_28] : memref<9x8x128xbf16, #tpu.memory_space<vmem>>, vector<1x8x128xbf16>
    %25 = vector.shape_cast %24 : vector<1x8x128xbf16> to vector<8x128xbf16>
    %cst_29 = arith.constant dense<0.000000e+00> : vector<16x128xf32>
    %26 = tpu.matmul %19, %25, %cst_29 {dimension_numbers = #tpu.dot_dimension_numbers<[1], [0], [0], [1], [0, 0, 1, 1], [], []>} : vector<16x8xbf16>, vector<8x128xbf16>, vector<16x128xf32> -> vector<16x128xf32>
    %27 = arith.addf %18, %26 : vector<16x128xf32>
    %c2 = arith.constant 2 : index
    %c0_30 = arith.constant 0 : index
    %28 = vector.load %arg9[%c2, %c0_30] : memref<24x8xbf16, #tpu.memory_space<vmem>>, vector<16x8xbf16>
    %c2_31 = arith.constant 2 : index
    %c0_32 = arith.constant 0 : index
    %c0_33 = arith.constant 0 : index
    %29 = vector.load %arg5[%c2_31, %c0_32, %c0_33] : memref<9x8x128xbf16, #tpu.memory_space<vmem>>, vector<1x8x128xbf16>
    %30 = vector.shape_cast %29 : vector<1x8x128xbf16> to vector<8x128xbf16>
    %cst_34 = arith.constant dense<0.000000e+00> : vector<16x128xf32>
    %31 = tpu.matmul %28, %30, %cst_34 {dimension_numbers = #tpu.dot_dimension_numbers<[1], [0], [0], [1], [0, 0, 1, 1], [], []>} : vector<16x8xbf16>, vector<8x128xbf16>, vector<16x128xf32> -> vector<16x128xf32>
    %32 = arith.addf %23, %31 : vector<16x128xf32>
    %c2_35 = arith.constant 2 : index
    %c0_36 = arith.constant 0 : index
    %c0_37 = arith.constant 0 : index
    %33 = vector.load %arg4[%c2_35, %c0_36, %c0_37] : memref<9x8x128xbf16, #tpu.memory_space<vmem>>, vector<1x8x128xbf16>
    %34 = vector.shape_cast %33 : vector<1x8x128xbf16> to vector<8x128xbf16>
    %cst_38 = arith.constant dense<0.000000e+00> : vector<16x128xf32>
    %35 = tpu.matmul %28, %34, %cst_38 {dimension_numbers = #tpu.dot_dimension_numbers<[1], [0], [0], [1], [0, 0, 1, 1], [], []>} : vector<16x8xbf16>, vector<8x128xbf16>, vector<16x128xf32> -> vector<16x128xf32>
    %36 = arith.addf %27, %35 : vector<16x128xf32>
    %c3 = arith.constant 3 : index
    %c0_39 = arith.constant 0 : index
    %37 = vector.load %arg9[%c3, %c0_39] : memref<24x8xbf16, #tpu.memory_space<vmem>>, vector<16x8xbf16>
    %c3_40 = arith.constant 3 : index
    %c0_41 = arith.constant 0 : index
    %c0_42 = arith.constant 0 : index
    %38 = vector.load %arg5[%c3_40, %c0_41, %c0_42] : memref<9x8x128xbf16, #tpu.memory_space<vmem>>, vector<1x8x128xbf16>
    %39 = vector.shape_cast %38 : vector<1x8x128xbf16> to vector<8x128xbf16>
    %cst_43 = arith.constant dense<0.000000e+00> : vector<16x128xf32>
    %40 = tpu.matmul %37, %39, %cst_43 {dimension_numbers = #tpu.dot_dimension_numbers<[1], [0], [0], [1], [0, 0, 1, 1], [], []>} : vector<16x8xbf16>, vector<8x128xbf16>, vector<16x128xf32> -> vector<16x128xf32>
    %41 = arith.addf %32, %40 : vector<16x128xf32>
    %c3_44 = arith.constant 3 : index
    %c0_45 = arith.constant 0 : index
    %c0_46 = arith.constant 0 : index
    %42 = vector.load %arg4[%c3_44, %c0_45, %c0_46] : memref<9x8x128xbf16, #tpu.memory_space<vmem>>, vector<1x8x128xbf16>
    %43 = vector.shape_cast %42 : vector<1x8x128xbf16> to vector<8x128xbf16>
    %cst_47 = arith.constant dense<0.000000e+00> : vector<16x128xf32>
    %44 = tpu.matmul %37, %43, %cst_47 {dimension_numbers = #tpu.dot_dimension_numbers<[1], [0], [0], [1], [0, 0, 1, 1], [], []>} : vector<16x8xbf16>, vector<8x128xbf16>, vector<16x128xf32> -> vector<16x128xf32>
    %45 = arith.addf %36, %44 : vector<16x128xf32>
    %c4 = arith.constant 4 : index
    %c0_48 = arith.constant 0 : index
    %46 = vector.load %arg9[%c4, %c0_48] : memref<24x8xbf16, #tpu.memory_space<vmem>>, vector<16x8xbf16>
    %c4_49 = arith.constant 4 : index
    %c0_50 = arith.constant 0 : index
    %c0_51 = arith.constant 0 : index
    %47 = vector.load %arg5[%c4_49, %c0_50, %c0_51] : memref<9x8x128xbf16, #tpu.memory_space<vmem>>, vector<1x8x128xbf16>
    %48 = vector.shape_cast %47 : vector<1x8x128xbf16> to vector<8x128xbf16>
    %cst_52 = arith.constant dense<0.000000e+00> : vector<16x128xf32>
    %49 = tpu.matmul %46, %48, %cst_52 {dimension_numbers = #tpu.dot_dimension_numbers<[1], [0], [0], [1], [0, 0, 1, 1], [], []>} : vector<16x8xbf16>, vector<8x128xbf16>, vector<16x128xf32> -> vector<16x128xf32>
    %50 = arith.addf %41, %49 : vector<16x128xf32>
    %c4_53 = arith.constant 4 : index
    %c0_54 = arith.constant 0 : index
    %c0_55 = arith.constant 0 : index
    %51 = vector.load %arg4[%c4_53, %c0_54, %c0_55] : memref<9x8x128xbf16, #tpu.memory_space<vmem>>, vector<1x8x128xbf16>
    %52 = vector.shape_cast %51 : vector<1x8x128xbf16> to vector<8x128xbf16>
    %cst_56 = arith.constant dense<0.000000e+00> : vector<16x128xf32>
    %53 = tpu.matmul %46, %52, %cst_56 {dimension_numbers = #tpu.dot_dimension_numbers<[1], [0], [0], [1], [0, 0, 1, 1], [], []>} : vector<16x8xbf16>, vector<8x128xbf16>, vector<16x128xf32> -> vector<16x128xf32>
    %54 = arith.addf %45, %53 : vector<16x128xf32>
    %c5 = arith.constant 5 : index
    %c0_57 = arith.constant 0 : index
    %55 = vector.load %arg9[%c5, %c0_57] : memref<24x8xbf16, #tpu.memory_space<vmem>>, vector<16x8xbf16>
    %c5_58 = arith.constant 5 : index
    %c0_59 = arith.constant 0 : index
    %c0_60 = arith.constant 0 : index
    %56 = vector.load %arg5[%c5_58, %c0_59, %c0_60] : memref<9x8x128xbf16, #tpu.memory_space<vmem>>, vector<1x8x128xbf16>
    %57 = vector.shape_cast %56 : vector<1x8x128xbf16> to vector<8x128xbf16>
    %cst_61 = arith.constant dense<0.000000e+00> : vector<16x128xf32>
    %58 = tpu.matmul %55, %57, %cst_61 {dimension_numbers = #tpu.dot_dimension_numbers<[1], [0], [0], [1], [0, 0, 1, 1], [], []>} : vector<16x8xbf16>, vector<8x128xbf16>, vector<16x128xf32> -> vector<16x128xf32>
    %59 = arith.addf %50, %58 : vector<16x128xf32>
    %c5_62 = arith.constant 5 : index
    %c0_63 = arith.constant 0 : index
    %c0_64 = arith.constant 0 : index
    %60 = vector.load %arg4[%c5_62, %c0_63, %c0_64] : memref<9x8x128xbf16, #tpu.memory_space<vmem>>, vector<1x8x128xbf16>
    %61 = vector.shape_cast %60 : vector<1x8x128xbf16> to vector<8x128xbf16>
    %cst_65 = arith.constant dense<0.000000e+00> : vector<16x128xf32>
    %62 = tpu.matmul %55, %61, %cst_65 {dimension_numbers = #tpu.dot_dimension_numbers<[1], [0], [0], [1], [0, 0, 1, 1], [], []>} : vector<16x8xbf16>, vector<8x128xbf16>, vector<16x128xf32> -> vector<16x128xf32>
    %63 = arith.addf %54, %62 : vector<16x128xf32>
    %c6 = arith.constant 6 : index
    %c0_66 = arith.constant 0 : index
    %64 = vector.load %arg9[%c6, %c0_66] : memref<24x8xbf16, #tpu.memory_space<vmem>>, vector<16x8xbf16>
    %c6_67 = arith.constant 6 : index
    %c0_68 = arith.constant 0 : index
    %c0_69 = arith.constant 0 : index
    %65 = vector.load %arg5[%c6_67, %c0_68, %c0_69] : memref<9x8x128xbf16, #tpu.memory_space<vmem>>, vector<1x8x128xbf16>
    %66 = vector.shape_cast %65 : vector<1x8x128xbf16> to vector<8x128xbf16>
    %cst_70 = arith.constant dense<0.000000e+00> : vector<16x128xf32>
    %67 = tpu.matmul %64, %66, %cst_70 {dimension_numbers = #tpu.dot_dimension_numbers<[1], [0], [0], [1], [0, 0, 1, 1], [], []>} : vector<16x8xbf16>, vector<8x128xbf16>, vector<16x128xf32> -> vector<16x128xf32>
    %68 = arith.addf %59, %67 : vector<16x128xf32>
    %c6_71 = arith.constant 6 : index
    %c0_72 = arith.constant 0 : index
    %c0_73 = arith.constant 0 : index
    %69 = vector.load %arg4[%c6_71, %c0_72, %c0_73] : memref<9x8x128xbf16, #tpu.memory_space<vmem>>, vector<1x8x128xbf16>
    %70 = vector.shape_cast %69 : vector<1x8x128xbf16> to vector<8x128xbf16>
    %cst_74 = arith.constant dense<0.000000e+00> : vector<16x128xf32>
    %71 = tpu.matmul %64, %70, %cst_74 {dimension_numbers = #tpu.dot_dimension_numbers<[1], [0], [0], [1], [0, 0, 1, 1], [], []>} : vector<16x8xbf16>, vector<8x128xbf16>, vector<16x128xf32> -> vector<16x128xf32>
    %72 = arith.addf %63, %71 : vector<16x128xf32>
    %c7 = arith.constant 7 : index
    %c0_75 = arith.constant 0 : index
    %73 = vector.load %arg9[%c7, %c0_75] : memref<24x8xbf16, #tpu.memory_space<vmem>>, vector<16x8xbf16>
    %c7_76 = arith.constant 7 : index
    %c0_77 = arith.constant 0 : index
    %c0_78 = arith.constant 0 : index
    %74 = vector.load %arg5[%c7_76, %c0_77, %c0_78] : memref<9x8x128xbf16, #tpu.memory_space<vmem>>, vector<1x8x128xbf16>
    %75 = vector.shape_cast %74 : vector<1x8x128xbf16> to vector<8x128xbf16>
    %cst_79 = arith.constant dense<0.000000e+00> : vector<16x128xf32>
    %76 = tpu.matmul %73, %75, %cst_79 {dimension_numbers = #tpu.dot_dimension_numbers<[1], [0], [0], [1], [0, 0, 1, 1], [], []>} : vector<16x8xbf16>, vector<8x128xbf16>, vector<16x128xf32> -> vector<16x128xf32>
    %77 = arith.addf %68, %76 : vector<16x128xf32>
    %c7_80 = arith.constant 7 : index
    %c0_81 = arith.constant 0 : index
    %c0_82 = arith.constant 0 : index
    %78 = vector.load %arg4[%c7_80, %c0_81, %c0_82] : memref<9x8x128xbf16, #tpu.memory_space<vmem>>, vector<1x8x128xbf16>
    %79 = vector.shape_cast %78 : vector<1x8x128xbf16> to vector<8x128xbf16>
    %cst_83 = arith.constant dense<0.000000e+00> : vector<16x128xf32>
    %80 = tpu.matmul %73, %79, %cst_83 {dimension_numbers = #tpu.dot_dimension_numbers<[1], [0], [0], [1], [0, 0, 1, 1], [], []>} : vector<16x8xbf16>, vector<8x128xbf16>, vector<16x128xf32> -> vector<16x128xf32>
    %81 = arith.addf %72, %80 : vector<16x128xf32>
    %c8 = arith.constant 8 : index
    %c0_84 = arith.constant 0 : index
    %82 = vector.load %arg9[%c8, %c0_84] : memref<24x8xbf16, #tpu.memory_space<vmem>>, vector<16x8xbf16>
    %c8_85 = arith.constant 8 : index
    %c0_86 = arith.constant 0 : index
    %c0_87 = arith.constant 0 : index
    %83 = vector.load %arg5[%c8_85, %c0_86, %c0_87] : memref<9x8x128xbf16, #tpu.memory_space<vmem>>, vector<1x8x128xbf16>
    %84 = vector.shape_cast %83 : vector<1x8x128xbf16> to vector<8x128xbf16>
    %cst_88 = arith.constant dense<0.000000e+00> : vector<16x128xf32>
    %85 = tpu.matmul %82, %84, %cst_88 {dimension_numbers = #tpu.dot_dimension_numbers<[1], [0], [0], [1], [0, 0, 1, 1], [], []>} : vector<16x8xbf16>, vector<8x128xbf16>, vector<16x128xf32> -> vector<16x128xf32>
    %86 = arith.addf %77, %85 : vector<16x128xf32>
    %c8_89 = arith.constant 8 : index
    %c0_90 = arith.constant 0 : index
    %c0_91 = arith.constant 0 : index
    %87 = vector.load %arg4[%c8_89, %c0_90, %c0_91] : memref<9x8x128xbf16, #tpu.memory_space<vmem>>, vector<1x8x128xbf16>
    %88 = vector.shape_cast %87 : vector<1x8x128xbf16> to vector<8x128xbf16>
    %cst_92 = arith.constant dense<0.000000e+00> : vector<16x128xf32>
    %89 = tpu.matmul %82, %88, %cst_92 {dimension_numbers = #tpu.dot_dimension_numbers<[1], [0], [0], [1], [0, 0, 1, 1], [], []>} : vector<16x8xbf16>, vector<8x128xbf16>, vector<16x128xf32> -> vector<16x128xf32>
    %90 = arith.addf %81, %89 : vector<16x128xf32>
    %cst_93 = arith.constant 5.000000e-01 : f32
    %91 = vector.broadcast %cst_93 : f32 to vector<16x128xf32>
    %92 = arith.mulf %91, %86 : vector<16x128xf32>
    %cst_94 = arith.constant 0.707106769 : f32
    %93 = vector.broadcast %cst_94 : f32 to vector<16x128xf32>
    %94 = arith.mulf %86, %93 : vector<16x128xf32>
    %95 = math.erf %94 : vector<16x128xf32>
    %cst_95 = arith.constant 1.000000e+00 : f32
    %96 = vector.broadcast %cst_95 : f32 to vector<16x128xf32>
    %97 = arith.addf %96, %95 : vector<16x128xf32>
    %98 = arith.mulf %92, %97 : vector<16x128xf32>
    %99 = arith.mulf %90, %98 : vector<16x128xf32>
    %c0_96 = arith.constant 0 : index
    %c0_97 = arith.constant 0 : index
    %c0_98 = arith.constant 0 : index
    %100 = vector.load %arg8[%c0_96, %c0_97, %c0_98] : memref<1x16x128xf32, #tpu.memory_space<vmem>>, vector<1x16x128xf32>
    %101 = vector.shape_cast %100 : vector<1x16x128xf32> to vector<16x128xf32>
    %102 = vector.shape_cast %99 : vector<16x128xf32> to vector<1x16x128xf32>
    tpu.vector_store %arg8[%c0_96, %c0_97, %c0_98], %102 {strides = array<i32>} : memref<1x16x128xf32, #tpu.memory_space<vmem>>, vector<1x16x128xf32>,
    return
  }
  func.func @transform_0(%arg0: i32, %arg1: i32) -> (i32, i32, i32) {
    %c0_i32 = arith.constant 0 : i32
    %c0_i32_0 = arith.constant 0 : i32
    return %arg0, %arg1, %c0_i32 : i32, i32, i32
  }
  func.func @transform_1(%arg0: i32, %arg1: i32) -> (i32, i32, i32) {
    %c1_i32 = arith.constant 1 : i32
    %0 = arith.addi %arg1, %c1_i32 : i32
    %c2_i32 = arith.constant 2 : i32
    %1 = arith.muli %0, %c2_i32 : i32
    %c0_i32 = arith.constant 0 : i32
    %c0_i32_0 = arith.constant 0 : i32
    return %arg0, %1, %c0_i32 : i32, i32, i32
  }
  func.func @transform_2(%arg0: i32, %arg1: i32) -> (i32, i32, i32) {
    %c0_i32 = arith.constant 0 : i32
    %c0_i32_0 = arith.constant 0 : i32
    %c0_i32_1 = arith.constant 0 : i32
    %c0_i32_2 = arith.constant 0 : i32
    return %c0_i32, %c0_i32_0, %c0_i32_1 : i32, i32, i32
  }
  func.func @transform_3(%arg0: i32, %arg1: i32) -> (i32, i32, i32) {
    %c0_i32 = arith.constant 0 : i32
    %c0_i32_0 = arith.constant 0 : i32
    %c0_i32_1 = arith.constant 0 : i32
    %c0_i32_2 = arith.constant 0 : i32
    return %c0_i32, %c0_i32_0, %c0_i32_1 : i32, i32, i32
  }
  func.func @transform_4(%arg0: i32, %arg1: i32) -> (i32, i32) {
    %c0_i32 = arith.constant 0 : i32
    %c0_i32_0 = arith.constant 0 : i32
    %c0_i32_1 = arith.constant 0 : i32
    return %c0_i32, %c0_i32_0 : i32, i32
  }
  func.func @transform_5(%arg0: i32, %arg1: i32) -> (i32, i32) {
    %c0_i32 = arith.constant 0 : i32
    %c0_i32_0 = arith.constant 0 : i32
    %c0_i32_1 = arith.constant 0 : i32
    return %c0_i32, %c0_i32_0 : i32, i32
  }
  func.func @transform_6(%arg0: i32, %arg1: i32) -> (i32, i32, i32) {
    %c0_i32 = arith.constant 0 : i32
    %c0_i32_0 = arith.constant 0 : i32
    return %arg0, %arg1, %c0_i32 : i32, i32, i32
  }
}

module attributes {stable_mosaic.version = 11 : i64} {
  func.func @_geglu_conv_kernel(%arg0: i32, %arg1: i32, %arg2: memref<1x16x8xbf16, #tpu.memory_space<vmem>>, %arg3: memref<1x8x8xbf16, #tpu.memory_space<vmem>>, %arg4: memref<9x8x128xbf16, #tpu.memory_space<vmem>>, %arg5: memref<9x8x128xbf16, #tpu.memory_space<vmem>>, %arg6: memref<1x128xf32, #tpu.memory_space<vmem>>, %arg7: memref<1x128xf32, #tpu.memory_space<vmem>>, %arg8: memref<1x16x128xf32, #tpu.memory_space<vmem>>, %arg9: memref<24x8xbf16, #tpu.memory_space<vmem>>) attributes {dimension_semantics = [#tpu.dimension_semantics<parallel>, #tpu.dimension_semantics<parallel>], iteration_bounds = array<i64: 2, 4>, scalar_prefetch = 0 : i64, scratch_operands = 1 : i64, tpu.core_type = #tpu.core_type<tc>, window_params = [{transform_indices = @transform_0, window_bounds = array<i64: 1, 16, 8>}, {transform_indices = @transform_1, window_bounds = array<i64: 1, 8, 8>}, {pipeline_mode = #tpu.pipeline_mode<synchronous>, transform_indices = @transform_2, window_bounds = array<i64: 9, 8, 128>}, {pipeline_mode = #tpu.pipeline_mode<synchronous>, transform_indices = @transform_3, window_bounds = array<i64: 9, 8, 128>}, {pipeline_mode = #tpu.pipeline_mode<synchronous>, transform_indices = @transform_4, window_bounds = array<i64: 1, 128>}, {pipeline_mode = #tpu.pipeline_mode<synchronous>, transform_indices = @transform_5, window_bounds = array<i64: 1, 128>}, {transform_indices = @transform_6, window_bounds = array<i64: 1, 16, 128>}]} {
    %c0 = arith.constant 0 : index
    %c0_0 = arith.constant 0 : index
    %c0_1 = arith.constant 0 : index
    %0 = vector.load %arg2[%c0, %c0_0, %c0_1] : memref<1x16x8xbf16, #tpu.memory_space<vmem>>, vector<1x16x8xbf16>
    %1 = vector.shape_cast %0 : vector<1x16x8xbf16> to vector<16x8xbf16>
    %c0_2 = arith.constant 0 : index
    %c0_3 = arith.constant 0 : index
    %2 = vector.load %arg9[%c0_2, %c0_3] : memref<24x8xbf16, #tpu.memory_space<vmem>>, vector<16x8xbf16>
    tpu.vector_store %arg9[%c0_2, %c0_3], %1 {strides = array<i32>} : memref<24x8xbf16, #tpu.memory_space<vmem>>, vector<16x8xbf16>,
    %c0_4 = arith.constant 0 : index
    %c0_5 = arith.constant 0 : index
    %c0_6 = arith.constant 0 : index
    %3 = vector.load %arg3[%c0_4, %c0_5, %c0_6] : memref<1x8x8xbf16, #tpu.memory_space<vmem>>, vector<1x8x8xbf16>
    %4 = vector.shape_cast %3 : vector<1x8x8xbf16> to vector<8x8xbf16>
    %c16 = arith.constant 16 : index
    %c0_7 = arith.constant 0 : index
    %5 = vector.load %arg9[%c16, %c0_7] : memref<24x8xbf16, #tpu.memory_space<vmem>>, vector<8x8xbf16>
    tpu.vector_store %arg9[%c16, %c0_7], %4 {strides = array<i32>} : memref<24x8xbf16, #tpu.memory_space<vmem>>, vector<8x8xbf16>,
    %c0_8 = arith.constant 0 : index
    %c0_9 = arith.constant 0 : index
    %6 = vector.load %arg6[%c0_8, %c0_9] : memref<1x128xf32, #tpu.memory_space<vmem>>, vector<1x128xf32>
    %c0_10 = arith.constant 0 : index
    %c0_11 = arith.constant 0 : index
    %7 = vector.load %arg7[%c0_10, %c0_11] : memref<1x128xf32, #tpu.memory_space<vmem>>, vector<1x128xf32>
    %c0_12 = arith.constant 0 : index
    %c0_13 = arith.constant 0 : index
    %8 = vector.load %arg9[%c0_12, %c0_13] : memref<24x8xbf16, #tpu.memory_space<vmem>>, vector<16x8xbf16>
    %c0_14 = arith.constant 0 : index
    %c0_15 = arith.constant 0 : index
    %c0_16 = arith.constant 0 : index
    %9 = vector.load %arg5[%c0_14, %c0_15, %c0_16] : memref<9x8x128xbf16, #tpu.memory_space<vmem>>, vector<1x8x128xbf16>
    %10 = vector.shape_cast %9 : vector<1x8x128xbf16> to vector<8x128xbf16>
    %cst = arith.constant dense<0.000000e+00> : vector<16x128xf32>
    %11 = tpu.matmul %8, %10, %cst {dimension_numbers = #tpu.dot_dimension_numbers<[1], [0], [0], [1], [0, 0, 1, 1], [], []>} : vector<16x8xbf16>, vector<8x128xbf16>, vector<16x128xf32> -> vector<16x128xf32>
    %12 = vector.broadcast %7 : vector<1x128xf32> to vector<16x128xf32>
    %13 = arith.addf %12, %11 : vector<16x128xf32>
    %c0_17 = arith.constant 0 : index
    %c0_18 = arith.constant 0 : index
    %c0_19 = arith.constant 0 : index
    %14 = vector.load %arg4[%c0_17, %c0_18, %c0_19] : memref<9x8x128xbf16, #tpu.memory_space<vmem>>, vector<1x8x128xbf16>
    %15 = vector.shape_cast %14 : vector<1x8x128xbf16> to vector<8x128xbf16>
    %cst_20 = arith.constant dense<0.000000e+00> : vector<16x128xf32>
    %16 = tpu.matmul %8, %15, %cst_20 {dimension_numbers = #tpu.dot_dimension_numbers<[1], [0], [0], [1], [0, 0, 1, 1], [], []>} : vector<16x8xbf16>, vector<8x128xbf16>, vector<16x128xf32> -> vector<16x128xf32>
    %17 = vector.broadcast %6 : vector<1x128xf32> to vector<16x128xf32>
    %18 = arith.addf %17, %16 : vector<16x128xf32>
    %c1 = arith.constant 1 : index
    %c0_21 = arith.constant 0 : index
    %19 = vector.load %arg9[%c1, %c0_21] : memref<24x8xbf16, #tpu.memory_space<vmem>>, vector<16x8xbf16>
    %c1_22 = arith.constant 1 : index
    %c0_23 = arith.constant 0 : index
    %c0_24 = arith.constant 0 : index
    %20 = vector.load %arg5[%c1_22, %c0_23, %c0_24] : memref<9x8x128xbf16, #tpu.memory_space<vmem>>, vector<1x8x128xbf16>
    %21 = vector.shape_cast %20 : vector<1x8x128xbf16> to vector<8x128xbf16>
    %cst_25 = arith.constant dense<0.000000e+00> : vector<16x128xf32>
    %22 = tpu.matmul %19, %21, %cst_25 {dimension_numbers = #tpu.dot_dimension_numbers<[1], [0], [0], [1], [0, 0, 1, 1], [], []>} : vector<16x8xbf16>, vector<8x128xbf16>, vector<16x128xf32> -> vector<16x128xf32>
    %23 = arith.addf %13, %22 : vector<16x128xf32>
    %c1_26 = arith.constant 1 : index
    %c0_27 = arith.constant 0 : index
    %c0_28 = arith.constant 0 : index
    %24 = vector.load %arg4[%c1_26, %c0_27, %c0_28] : memref<9x8x128xbf16, #tpu.memory_space<vmem>>, vector<1x8x128xbf16>
    %25 = vector.shape_cast %24 : vector<1x8x128xbf16> to vector<8x128xbf16>
    %cst_29 = arith.constant dense<0.000000e+00> : vector<16x128xf32>
    %26 = tpu.matmul %19, %25, %cst_29 {dimension_numbers = #tpu.dot_dimension_numbers<[1], [0], [0], [1], [0, 0, 1, 1], [], []>} : vector<16x8xbf16>, vector<8x128xbf16>, vector<16x128xf32> -> vector<16x128xf32>
    %27 = arith.addf %18, %26 : vector<16x128xf32>
    %c2 = arith.constant 2 : index
    %c0_30 = arith.constant 0 : index
    %28 = vector.load %arg9[%c2, %c0_30] : memref<24x8xbf16, #tpu.memory_space<vmem>>, vector<16x8xbf16>
    %c2_31 = arith.constant 2 : index
    %c0_32 = arith.constant 0 : index
    %c0_33 = arith.constant 0 : index
    %29 = vector.load %arg5[%c2_31, %c0_32, %c0_33] : memref<9x8x128xbf16, #tpu.memory_space<vmem>>, vector<1x8x128xbf16>
    %30 = vector.shape_cast %29 : vector<1x8x128xbf16> to vector<8x128xbf16>
    %cst_34 = arith.constant dense<0.000000e+00> : vector<16x128xf32>
    %31 = tpu.matmul %28, %30, %cst_34 {dimension_numbers = #tpu.dot_dimension_numbers<[1], [0], [0], [1], [0, 0, 1, 1], [], []>} : vector<16x8xbf16>, vector<8x128xbf16>, vector<16x128xf32> -> vector<16x128xf32>
    %32 = arith.addf %23, %31 : vector<16x128xf32>
    %c2_35 = arith.constant 2 : index
    %c0_36 = arith.constant 0 : index
    %c0_37 = arith.constant 0 : index
    %33 = vector.load %arg4[%c2_35, %c0_36, %c0_37] : memref<9x8x128xbf16, #tpu.memory_space<vmem>>, vector<1x8x128xbf16>
    %34 = vector.shape_cast %33 : vector<1x8x128xbf16> to vector<8x128xbf16>
    %cst_38 = arith.constant dense<0.000000e+00> : vector<16x128xf32>
    %35 = tpu.matmul %28, %34, %cst_38 {dimension_numbers = #tpu.dot_dimension_numbers<[1], [0], [0], [1], [0, 0, 1, 1], [], []>} : vector<16x8xbf16>, vector<8x128xbf16>, vector<16x128xf32> -> vector<16x128xf32>
    %36 = arith.addf %27, %35 : vector<16x128xf32>
    %c3 = arith.constant 3 : index
    %c0_39 = arith.constant 0 : index
    %37 = vector.load %arg9[%c3, %c0_39] : memref<24x8xbf16, #tpu.memory_space<vmem>>, vector<16x8xbf16>
    %c3_40 = arith.constant 3 : index
    %c0_41 = arith.constant 0 : index
    %c0_42 = arith.constant 0 : index
    %38 = vector.load %arg5[%c3_40, %c0_41, %c0_42] : memref<9x8x128xbf16, #tpu.memory_space<vmem>>, vector<1x8x128xbf16>
    %39 = vector.shape_cast %38 : vector<1x8x128xbf16> to vector<8x128xbf16>
    %cst_43 = arith.constant dense<0.000000e+00> : vector<16x128xf32>
    %40 = tpu.matmul %37, %39, %cst_43 {dimension_numbers = #tpu.dot_dimension_numbers<[1], [0], [0], [1], [0, 0, 1, 1], [], []>} : vector<16x8xbf16>, vector<8x128xbf16>, vector<16x128xf32> -> vector<16x128xf32>
    %41 = arith.addf %32, %40 : vector<16x128xf32>
    %c3_44 = arith.constant 3 : index
    %c0_45 = arith.constant 0 : index
    %c0_46 = arith.constant 0 : index
    %42 = vector.load %arg4[%c3_44, %c0_45, %c0_46] : memref<9x8x128xbf16, #tpu.memory_space<vmem>>, vector<1x8x128xbf16>
    %43 = vector.shape_cast %42 : vector<1x8x128xbf16> to vector<8x128xbf16>
    %cst_47 = arith.constant dense<0.000000e+00> : vector<16x128xf32>
    %44 = tpu.matmul %37, %43, %cst_47 {dimension_numbers = #tpu.dot_dimension_numbers<[1], [0], [0], [1], [0, 0, 1, 1], [], []>} : vector<16x8xbf16>, vector<8x128xbf16>, vector<16x128xf32> -> vector<16x128xf32>
    %45 = arith.addf %36, %44 : vector<16x128xf32>
    %c4 = arith.constant 4 : index
    %c0_48 = arith.constant 0 : index
    %46 = vector.load %arg9[%c4, %c0_48] : memref<24x8xbf16, #tpu.memory_space<vmem>>, vector<16x8xbf16>
    %c4_49 = arith.constant 4 : index
    %c0_50 = arith.constant 0 : index
    %c0_51 = arith.constant 0 : index
    %47 = vector.load %arg5[%c4_49, %c0_50, %c0_51] : memref<9x8x128xbf16, #tpu.memory_space<vmem>>, vector<1x8x128xbf16>
    %48 = vector.shape_cast %47 : vector<1x8x128xbf16> to vector<8x128xbf16>
    %cst_52 = arith.constant dense<0.000000e+00> : vector<16x128xf32>
    %49 = tpu.matmul %46, %48, %cst_52 {dimension_numbers = #tpu.dot_dimension_numbers<[1], [0], [0], [1], [0, 0, 1, 1], [], []>} : vector<16x8xbf16>, vector<8x128xbf16>, vector<16x128xf32> -> vector<16x128xf32>
    %50 = arith.addf %41, %49 : vector<16x128xf32>
    %c4_53 = arith.constant 4 : index
    %c0_54 = arith.constant 0 : index
    %c0_55 = arith.constant 0 : index
    %51 = vector.load %arg4[%c4_53, %c0_54, %c0_55] : memref<9x8x128xbf16, #tpu.memory_space<vmem>>, vector<1x8x128xbf16>
    %52 = vector.shape_cast %51 : vector<1x8x128xbf16> to vector<8x128xbf16>
    %cst_56 = arith.constant dense<0.000000e+00> : vector<16x128xf32>
    %53 = tpu.matmul %46, %52, %cst_56 {dimension_numbers = #tpu.dot_dimension_numbers<[1], [0], [0], [1], [0, 0, 1, 1], [], []>} : vector<16x8xbf16>, vector<8x128xbf16>, vector<16x128xf32> -> vector<16x128xf32>
    %54 = arith.addf %45, %53 : vector<16x128xf32>
    %c5 = arith.constant 5 : index
    %c0_57 = arith.constant 0 : index
    %55 = vector.load %arg9[%c5, %c0_57] : memref<24x8xbf16, #tpu.memory_space<vmem>>, vector<16x8xbf16>
    %c5_58 = arith.constant 5 : index
    %c0_59 = arith.constant 0 : index
    %c0_60 = arith.constant 0 : index
    %56 = vector.load %arg5[%c5_58, %c0_59, %c0_60] : memref<9x8x128xbf16, #tpu.memory_space<vmem>>, vector<1x8x128xbf16>
    %57 = vector.shape_cast %56 : vector<1x8x128xbf16> to vector<8x128xbf16>
    %cst_61 = arith.constant dense<0.000000e+00> : vector<16x128xf32>
    %58 = tpu.matmul %55, %57, %cst_61 {dimension_numbers = #tpu.dot_dimension_numbers<[1], [0], [0], [1], [0, 0, 1, 1], [], []>} : vector<16x8xbf16>, vector<8x128xbf16>, vector<16x128xf32> -> vector<16x128xf32>
    %59 = arith.addf %50, %58 : vector<16x128xf32>
    %c5_62 = arith.constant 5 : index
    %c0_63 = arith.constant 0 : index
    %c0_64 = arith.constant 0 : index
    %60 = vector.load %arg4[%c5_62, %c0_63, %c0_64] : memref<9x8x128xbf16, #tpu.memory_space<vmem>>, vector<1x8x128xbf16>
    %61 = vector.shape_cast %60 : vector<1x8x128xbf16> to vector<8x128xbf16>
    %cst_65 = arith.constant dense<0.000000e+00> : vector<16x128xf32>
    %62 = tpu.matmul %55, %61, %cst_65 {dimension_numbers = #tpu.dot_dimension_numbers<[1], [0], [0], [1], [0, 0, 1, 1], [], []>} : vector<16x8xbf16>, vector<8x128xbf16>, vector<16x128xf32> -> vector<16x128xf32>
    %63 = arith.addf %54, %62 : vector<16x128xf32>
    %c6 = arith.constant 6 : index
    %c0_66 = arith.constant 0 : index
    %64 = vector.load %arg9[%c6, %c0_66] : memref<24x8xbf16, #tpu.memory_space<vmem>>, vector<16x8xbf16>
    %c6_67 = arith.constant 6 : index
    %c0_68 = arith.constant 0 : index
    %c0_69 = arith.constant 0 : index
    %65 = vector.load %arg5[%c6_67, %c0_68, %c0_69] : memref<9x8x128xbf16, #tpu.memory_space<vmem>>, vector<1x8x128xbf16>
    %66 = vector.shape_cast %65 : vector<1x8x128xbf16> to vector<8x128xbf16>
    %cst_70 = arith.constant dense<0.000000e+00> : vector<16x128xf32>
    %67 = tpu.matmul %64, %66, %cst_70 {dimension_numbers = #tpu.dot_dimension_numbers<[1], [0], [0], [1], [0, 0, 1, 1], [], []>} : vector<16x8xbf16>, vector<8x128xbf16>, vector<16x128xf32> -> vector<16x128xf32>
    %68 = arith.addf %59, %67 : vector<16x128xf32>
    %c6_71 = arith.constant 6 : index
    %c0_72 = arith.constant 0 : index
    %c0_73 = arith.constant 0 : index
    %69 = vector.load %arg4[%c6_71, %c0_72, %c0_73] : memref<9x8x128xbf16, #tpu.memory_space<vmem>>, vector<1x8x128xbf16>
    %70 = vector.shape_cast %69 : vector<1x8x128xbf16> to vector<8x128xbf16>
    %cst_74 = arith.constant dense<0.000000e+00> : vector<16x128xf32>
    %71 = tpu.matmul %64, %70, %cst_74 {dimension_numbers = #tpu.dot_dimension_numbers<[1], [0], [0], [1], [0, 0, 1, 1], [], []>} : vector<16x8xbf16>, vector<8x128xbf16>, vector<16x128xf32> -> vector<16x128xf32>
    %72 = arith.addf %63, %71 : vector<16x128xf32>
    %c7 = arith.constant 7 : index
    %c0_75 = arith.constant 0 : index
    %73 = vector.load %arg9[%c7, %c0_75] : memref<24x8xbf16, #tpu.memory_space<vmem>>, vector<16x8xbf16>
    %c7_76 = arith.constant 7 : index
    %c0_77 = arith.constant 0 : index
    %c0_78 = arith.constant 0 : index
    %74 = vector.load %arg5[%c7_76, %c0_77, %c0_78] : memref<9x8x128xbf16, #tpu.memory_space<vmem>>, vector<1x8x128xbf16>
    %75 = vector.shape_cast %74 : vector<1x8x128xbf16> to vector<8x128xbf16>
    %cst_79 = arith.constant dense<0.000000e+00> : vector<16x128xf32>
    %76 = tpu.matmul %73, %75, %cst_79 {dimension_numbers = #tpu.dot_dimension_numbers<[1], [0], [0], [1], [0, 0, 1, 1], [], []>} : vector<16x8xbf16>, vector<8x128xbf16>, vector<16x128xf32> -> vector<16x128xf32>
    %77 = arith.addf %68, %76 : vector<16x128xf32>
    %c7_80 = arith.constant 7 : index
    %c0_81 = arith.constant 0 : index
    %c0_82 = arith.constant 0 : index
    %78 = vector.load %arg4[%c7_80, %c0_81, %c0_82] : memref<9x8x128xbf16, #tpu.memory_space<vmem>>, vector<1x8x128xbf16>
    %79 = vector.shape_cast %78 : vector<1x8x128xbf16> to vector<8x128xbf16>
    %cst_83 = arith.constant dense<0.000000e+00> : vector<16x128xf32>
    %80 = tpu.matmul %73, %79, %cst_83 {dimension_numbers = #tpu.dot_dimension_numbers<[1], [0], [0], [1], [0, 0, 1, 1], [], []>} : vector<16x8xbf16>, vector<8x128xbf16>, vector<16x128xf32> -> vector<16x128xf32>
    %81 = arith.addf %72, %80 : vector<16x128xf32>
    %c8 = arith.constant 8 : index
    %c0_84 = arith.constant 0 : index
    %82 = vector.load %arg9[%c8, %c0_84] : memref<24x8xbf16, #tpu.memory_space<vmem>>, vector<16x8xbf16>
    %c8_85 = arith.constant 8 : index
    %c0_86 = arith.constant 0 : index
    %c0_87 = arith.constant 0 : index
    %83 = vector.load %arg5[%c8_85, %c0_86, %c0_87] : memref<9x8x128xbf16, #tpu.memory_space<vmem>>, vector<1x8x128xbf16>
    %84 = vector.shape_cast %83 : vector<1x8x128xbf16> to vector<8x128xbf16>
    %cst_88 = arith.constant dense<0.000000e+00> : vector<16x128xf32>
    %85 = tpu.matmul %82, %84, %cst_88 {dimension_numbers = #tpu.dot_dimension_numbers<[1], [0], [0], [1], [0, 0, 1, 1], [], []>} : vector<16x8xbf16>, vector<8x128xbf16>, vector<16x128xf32> -> vector<16x128xf32>
    %86 = arith.addf %77, %85 : vector<16x128xf32>
    %c8_89 = arith.constant 8 : index
    %c0_90 = arith.constant 0 : index
    %c0_91 = arith.constant 0 : index
    %87 = vector.load %arg4[%c8_89, %c0_90, %c0_91] : memref<9x8x128xbf16, #tpu.memory_space<vmem>>, vector<1x8x128xbf16>
    %88 = vector.shape_cast %87 : vector<1x8x128xbf16> to vector<8x128xbf16>
    %cst_92 = arith.constant dense<0.000000e+00> : vector<16x128xf32>
    %89 = tpu.matmul %82, %88, %cst_92 {dimension_numbers = #tpu.dot_dimension_numbers<[1], [0], [0], [1], [0, 0, 1, 1], [], []>} : vector<16x8xbf16>, vector<8x128xbf16>, vector<16x128xf32> -> vector<16x128xf32>
    %90 = arith.addf %81, %89 : vector<16x128xf32>
    %cst_93 = arith.constant 5.000000e-01 : f32
    %91 = vector.broadcast %cst_93 : f32 to vector<16x128xf32>
    %92 = arith.mulf %91, %86 : vector<16x128xf32>
    %cst_94 = arith.constant 0.707106769 : f32
    %93 = vector.broadcast %cst_94 : f32 to vector<16x128xf32>
    %94 = arith.mulf %86, %93 : vector<16x128xf32>
    %95 = math.erf %94 : vector<16x128xf32>
    %cst_95 = arith.constant 1.000000e+00 : f32
    %96 = vector.broadcast %cst_95 : f32 to vector<16x128xf32>
    %97 = arith.addf %96, %95 : vector<16x128xf32>
    %98 = arith.mulf %92, %97 : vector<16x128xf32>
    %99 = arith.mulf %90, %98 : vector<16x128xf32>
    %c0_96 = arith.constant 0 : index
    %c0_97 = arith.constant 0 : index
    %c0_98 = arith.constant 0 : index
    %100 = vector.load %arg8[%c0_96, %c0_97, %c0_98] : memref<1x16x128xf32, #tpu.memory_space<vmem>>, vector<1x16x128xf32>
    %101 = vector.shape_cast %100 : vector<1x16x128xf32> to vector<16x128xf32>
    %102 = vector.shape_cast %99 : vector<16x128xf32> to vector<1x16x128xf32>
    tpu.vector_store %arg8[%c0_96, %c0_97, %c0_98], %102 {strides = array<i32>} : memref<1x16x128xf32, #tpu.memory_space<vmem>>, vector<1x16x128xf32>,
    return
  }
  func.func @transform_0(%arg0: i32, %arg1: i32) -> (i32, i32, i32) {
    %c0_i32 = arith.constant 0 : i32
    %c0_i32_0 = arith.constant 0 : i32
    return %arg0, %arg1, %c0_i32 : i32, i32, i32
  }
  func.func @transform_1(%arg0: i32, %arg1: i32) -> (i32, i32, i32) {
    %c1_i32 = arith.constant 1 : i32
    %0 = arith.addi %arg1, %c1_i32 : i32
    %c2_i32 = arith.constant 2 : i32
    %1 = arith.muli %0, %c2_i32 : i32
    %c0_i32 = arith.constant 0 : i32
    %c0_i32_0 = arith.constant 0 : i32
    return %arg0, %1, %c0_i32 : i32, i32, i32
  }
  func.func @transform_2(%arg0: i32, %arg1: i32) -> (i32, i32, i32) {
    %c0_i32 = arith.constant 0 : i32
    %c0_i32_0 = arith.constant 0 : i32
    %c0_i32_1 = arith.constant 0 : i32
    %c0_i32_2 = arith.constant 0 : i32
    return %c0_i32, %c0_i32_0, %c0_i32_1 : i32, i32, i32
  }
  func.func @transform_3(%arg0: i32, %arg1: i32) -> (i32, i32, i32) {
    %c0_i32 = arith.constant 0 : i32
    %c0_i32_0 = arith.constant 0 : i32
    %c0_i32_1 = arith.constant 0 : i32
    %c0_i32_2 = arith.constant 0 : i32
    return %c0_i32, %c0_i32_0, %c0_i32_1 : i32, i32, i32
  }
  func.func @transform_4(%arg0: i32, %arg1: i32) -> (i32, i32) {
    %c0_i32 = arith.constant 0 : i32
    %c0_i32_0 = arith.constant 0 : i32
    %c0_i32_1 = arith.constant 0 : i32
    return %c0_i32, %c0_i32_0 : i32, i32
  }
  func.func @transform_5(%arg0: i32, %arg1: i32) -> (i32, i32) {
    %c0_i32 = arith.constant 0 : i32
    %c0_i32_0 = arith.constant 0 : i32
    %c0_i32_1 = arith.constant 0 : i32
    return %c0_i32, %c0_i32_0 : i32, i32
  }
  func.func @transform_6(%arg0: i32, %arg1: i32) -> (i32, i32, i32) {
    %c0_i32 = arith.constant 0 : i32
    %c0_i32_0 = arith.constant 0 : i32
    return %arg0, %arg1, %c0_i32 : i32, i32, i32
  }
}

</mosaic_0001>

<bundles_post_ra>
// kernel: tpu_custom_call.1
= control target key start
LH: loop header
LB: loop body
LE: loop exit
PB: predicated region body
PF: predicated region fallthrough
CT: control target
= control target key end

     0   :  { %11 = vsyncpa [#allocation4], 0  ;;  %s1661_s0 = inlined_call_operand.vmem [shape: bf16[2,72,8], index: 0, kind: input, shape index: {}]   ;;  %s1662_s1 = inlined_call_operand.vmem [shape: bf16[2,72,8], index: 1, kind: input, shape index: {}]   ;;  %s1663_s2 = inlined_call_operand.vmem [shape: bf16[9,8,128], index: 2, kind: input, shape index: {}]   ;;  %s1664_s3 = inlined_call_operand.vmem [shape: bf16[9,8,128], index: 3, kind: input, shape index: {}]   ;;  %s1665_s4 = inlined_call_operand.vmem [shape: f32[1,128], index: 4, kind: input, shape index: {}]   ;;  %s1666_s5 = inlined_call_operand.vmem [shape: f32[1,128], index: 5, kind: input, shape index: {}]   ;;  %s1667_s6 = inlined_call_operand.hbm [shape: f32[2,64,128], index: 6, kind: output, shape index: {}]  }
   0x1   :  { %13 = vsyncpa [#allocation4 + $0x1], 0  ;;  %s1381_s21 = smov 0   ;;  %s1383_s22 = smov 0  }
   0x2   :  { %s1385_s23 = smov 0   ;;  %s1387_s24 = smov 0  }
   0x3   :  { %s1389_s25 = smov 0   ;;  %s1391_s26 = smov 0  }
   0x4   :  { %s1393_s27 = smov 0   ;;  %s1395_s28 = smov 0  }
   0x5 LB: > { %1671 = sst [smem:[#allocation6_spill]] %s1338_s27  ;;  %s1099_s29 = sadd.s32 4294967295, %s1342_s28   ;;  %s1342_s28 = sphi %s1395_s28, %s19_s28   ;;  %s1338_s27 = sphi %s1393_s27, %s1678_s27   ;;  %s1334_s26 = sphi %s1391_s26, %s1683_s26   ;;  %s1330_s25 = sphi %s1389_s25, %s1676_s25   ;;  %s1326_s24 = sphi %s1387_s24, %s1682_s24   ;;  %s1322_s23 = sphi %s1385_s23, %s1681_s23   ;;  %s1318_s22 = sphi %s1383_s22, %s1680_s22   ;;  %s1314_s21 = sphi %s1381_s21, %s1679_s21  }
   0x6   : > { %s1100_s30 = sadd.s32 4294967294, %s1342_s28   ;;  %s28_s7 = sadd.s32 1, %s1334_s26 }
   0x7   : > { %p29_p0 = scmp.ge.s32.totalorder %s28_s7, 4  ;;  %s31_s8 = sadd.s32 1, %s1338_s27 }
   0x8   : > { %p194_p1 = scmp.ne.s32.totalorder %s1322_s23, %s1318_s22  ;;  %p195_p2 = scmp.eq.s32.totalorder %s1099_s29, 7 }
   0x9   : > { %s1685_s7 = smov (%p29_p0, %s28_s7), 0  ;;  %s1687_s8 = smov (!%p29_p0, %s31_s8), %s1338_s27 }
   0xa   : > { %1672 = sst [smem:[#allocation7_spill]] %s1685_s7  ;;  %s180_s9 = ssub.s32 %s1334_s26, %s1685_s7 }
   0xb   : > { %p1432_p3 = por %p195_p2, %p194_p1  ;;  %p33_p4 = scmp.ge.s32.totalorder %s1687_s8, 2 }
   0xc   : > { %p200_p5 = scmp.ne.s32.totalorder %s1318_s22, %s1314_s21  ;;  %p201_p6 = scmp.eq.s32.totalorder %s1100_s30, 7 }
   0xd   : > { %p1105_p7 = scmp.ge.s32.totalorder %s1342_s28, 1  ;;  %s1689_s8 = smov (%p33_p4, %s1687_s8), 0 }
   0xe   : > { %1674 = sst [smem:[#allocation8_spill]] %s1689_s8  ;;  %p1441_p8 = por %p201_p6, %p200_p5 }
   0xf   : > { %p267_p9 = scmp.lt.s32.totalorder %s1342_s28, 9  ;;  %s179_s12 = ssub.s32 %s1338_s27, %s1689_s8 }
  0x10   : > { %s184_s13 = sadd.s32 1, %s1322_s23  ;;  %s181_s14 = sor.u32 %s180_s9, %s179_s12 }
  0x11   : > { %p268_p10 = pnand %p1105_p7, %p267_p9  ;;  %p182_p11 = scmp.eq.s32.totalorder %s181_s14, 0 }
  0x12   : > { %s1459_s20 = sshll.u32 (!%p268_p10), %s1326_s24, 1  ;;  %p320_p12 = scmp.lt.s32.totalorder (!%p268_p10), %s1330_s25, 1 }
  0x13   : > { %s1450_s15 = scalar_select %p182_p11, %s1322_s23, %s184_s13  }
  0x14   : > { %271 = sbr.rel (%p268_p10) target bundleno = 302 (0x12e), region = 44  ;;  %p322_p13 = scmp.lt.s32.totalorder (!%p268_p10), %s1459_s20, 8 }
  0x15   : > { %s1162_s9 = sadd.s32 (!%p268_p10), 2, %s1459_s20  ;;  %s312_s18 = sand.u32 (!%p268_p10), 1, %s1318_s22  }
  0x16   : > { %p337_p0 = scmp.lt.s32.totalorder (!%p268_p10), %s1162_s9, 8  ;;  %s982_s7 = scalar_lea.sflag (!%p268_p10), [#allocation4], %s312_s18 }
  0x19   : > { %v358_v0 = vld [vmem:[%s1664_s3] sm:$0xf]  ;;  %vm368_vm0 = vcmask 1043456   ;;  %v1121_v4 = vld [vmem:[%s1664_s3 + $0x8] sm:$0xf]  ;;  %s1475_s14 = scalar_select %p320_p12, %s1330_s25, 1 }
  0x1a   : > { %v391_v1 = vld [vmem:[%s1663_s2] sm:$0xf]  ;;  %v370_v2 = vsel %vm368_vm0, %v358_v0, 0  ;;  %v1117_v5 = vld [vmem:[%s1664_s3 + $0x4] sm:$0xf]  ;;  %v497_v7 = vsel %vm368_vm0, %v1121_v4, 0 }
  0x1b   : > { %v393_v3 = vsel %vm368_vm0, %v391_v1, 0  ;;  %379 = vmatpush.bf16.msra.mxu0 %v370_v2  ;;  %v1119_v6 = vld [vmem:[%s1663_s2 + $0x4] sm:$0xf]  ;;  %v444_v8 = vsel %vm368_vm0, %v1117_v5, 0  ;;  %s323_s16 = scalar_select %p322_p13, %s1459_s20, 8  ;;  %vm349_vm1 = vcmask 60416  }
  0x1c   : > { %402 = vmatpush.bf16.msra.mxu1 %v393_v3  ;;  %v465_v9 = vsel %vm368_vm0, %v1119_v6, 0  ;;  %453 = vmatpush.bf16.msra.mxu2 %v444_v8  ;;  %v1125_v10 = vld [vmem:[%s1664_s3 + $0xc] sm:$0xf]  ;;  %v1123_v11 = vld [vmem:[%s1663_s2 + $0x8] sm:$0xf]  ;;  %s1168_s30 = smul.u32 9, %s1475_s14 }
  0x1d   : > { %474 = vmatpush.bf16.msra.mxu3 %v465_v9  ;;  %v564_v12 = vsel %vm368_vm0, %v1125_v10, 0  ;;  %v518_v13 = vsel %vm368_vm0, %v1123_v11, 0  ;;  %v1127_v14 = vld [vmem:[%s1663_s2 + $0xc] sm:$0xf]  ;;  %s1691_s9 = smov (!%p337_p0, %s1162_s9), 8  ;;  %vm364_vm2 = vcmask 64512  }
  0x1e   : > { %s325_s13 = sadd.s32 %s1168_s30, %s323_s16  ;;  %v585_v15 = vsel %vm368_vm0, %v1127_v14, 0  ;;  %s340_s29 = sadd.s32 %s1168_s30, %s1691_s9  ;;  %v1129_v19 = vld [vmem:[%s1664_s3 + $0x10] sm:$0xf]  ;;  %v1133_v39 = vld [vmem:[%s1664_s3 + $0x14] sm:$0xf]  ;;  %vm489_vm4 = vcmask 1046528  }
  0x1f   : > { %506 = vmatpush.bf16.msrb.mxu0 %v497_v7  ;;  %s1108_s17 = sshll.u32 %s325_s13, 2  ;;  %s1110_s8 = sshll.u32 %s340_s29, 2  ;;  %v1131_v20 = vld [vmem:[%s1663_s2 + $0x10] sm:$0xf]  ;;  %v617_v24 = vsel %vm368_vm0, %v1129_v19, 0  ;;  %v684_v45 = vsel %vm368_vm0, %v1133_v39, 0 }
  0x20   : > { %573 = vmatpush.bf16.msrb.mxu2 %v564_v12  ;;  %527 = vmatpush.bf16.msrb.mxu1 %v518_v13  ;;  %s327_s19 = scalar_lea.vmem %s1661_s0, %s1108_s17  ;;  %s342_s16 = scalar_lea.vmem %s1662_s1, %s1110_s8  ;;  %v638_v25 = vsel %vm368_vm0, %v1131_v20, 0  ;;  %v1135_v40 = vld [vmem:[%s1663_s2 + $0x14] sm:$0xf]  ;;  %vm427_vm3 = vsmask.f32 7424  ;;  %vm609_vm6 = vcmask 1045504  }
  0x21   : > { %594 = vmatpush.bf16.msrb.mxu3 %v585_v15  ;;  %v347_v16 = vld [vmem:[%s327_s19] sm:$0xf]  ;;  %v348_v17 = vld [vmem:[%s327_s19 + $0x4] sm:$0xf]  ;;  %v705_v46 = vsel %vm368_vm0, %v1135_v40, 0  ;;  %vm729_vm8 = vcmask 1044480  }
  0x22   : > { %350 = vst.msk [vmem:[#allocation2] sm:$0xf] %vm349_vm1, %v347_v16  ;;  %v352_v18 = vld [vmem:[%s342_s16] sm:$0xf]  ;;  %v1137_v48 = vld [vmem:[%s1664_s3 + $0x18] sm:$0xf] }
  0x23   : > { %351 = vst.msk [vmem:[#allocation2 + $0x4] sm:$0xf] %vm349_vm1, %v348_v17  ;;  %v1139_v50 = vld [vmem:[%s1663_s2 + $0x18] sm:$0xf]  ;;  %v737_v56 = vsel %vm368_vm0, %v1137_v48, 0  ;;  %s1153_s19 = sshll.u32 %s1330_s25, 3 }
  0x24   : > { %353 = vst.msk [vmem:[#allocation2 + $0x8] sm:$0xf] %vm349_vm1, %v352_v18  ;;  %v758_v57 = vsel %vm368_vm0, %v1139_v50, 0  ;;  %vm542_vm5 = vsmask.f32 6400  ;;  %s1106_s29 = sshll.u32 %s312_s18, 4  ;;  %s993_s12 = sadd.s32 %s1153_s19, %s1459_s20 }
  0x25   : > { %v1141_v4 = vld [vmem:[%s1664_s3 + $0x1c] sm:$0xf]  ;;  %v1145_v12 = vld [vmem:[%s1664_s3 + $0x20] sm:$0xf]  ;;  %vm662_vm7 = vsmask.f32 5376 }
  0x26   : > { %v1143_v5 = vld [vmem:[%s1663_s2 + $0x1c] sm:$0xf]  ;;  %v804_v10 = vsel %vm368_vm0, %v1141_v4, 0  ;;  %v1147_v14 = vld [vmem:[%s1663_s2 + $0x20] sm:$0xf]  ;;  %v850_v20 = vsel %vm368_vm0, %v1145_v12, 0 }
  0x27   : > { %v825_v11 = vsel %vm368_vm0, %v1143_v5, 0  ;;  %vm782_vm9 = vsmask.f32 4352  ;;  %s1154_s25 = sshll.u32 %s993_s12, 3  ;;  %s314_s16 = scalar_lea.vmem [#allocation3], %s1106_s29 }
  0x28   : > { %s995_s13 = scalar_lea.hbm %s1667_s6, %s1154_s25  ;;  %s996_s14 = sshll.u32 %s314_s16, 4  ;;  %s997_s14 = int_to_ptr.vmem [resolvable:$true] %s996_s14 }
  0x29   : > { %v483_v23 = vld [vmem:[#allocation2] sm:$0xe]  ;;  %s998_s27 = sshll.u32 %s995_s13, 4  ;;  %s1268_s19 = scalar_lea.hbm %s1667_s6, 128  ;;  %s999_s27 = int_to_ptr.hbm [resolvable:$true] %s998_s27 }
  0x2a   : > { %v1163_v21 = vld [vmem:[#allocation2] sm:$0xff]  ;;  %v487_v28 = vunpack.c.l.b16 %v483_v23  ;;  %s1262_s8 = sshra.s32 %s999_s27, 4  ;;  %s1263_s8 = int_to_ptr.hbm [resolvable:$true] %s1262_s8 }
  0x2b   : > { %v1165_v22 = vld [vmem:[#allocation2] sm:$0xff]   ;;  %1115 = vmatmul.msk.bf16.vlgmr.msra.gmra.mxu0 %vm364_vm2, %v1163_v21  ;;  %1116 = vmatmul.msk.bf16.vlgmr.msra.gmra.mxu1 %vm364_vm2, %v1163_v21  ;;  %v416_v29 = vld [vmem:[#allocation2 + $0x8] sm:$0x1]  ;;  %v871_v21 = vsel %vm368_vm0, %v1147_v14, 0  ;;  %s1264_s30 = scalar_lea.hbm %s1263_s8, 16  ;;  %p1269_p5 = scmp.lt.s32.totalorder %s1263_s8, %s1667_s6 }
  0x2c   : > { %v431_v26 = vshll.u32 %v1165_v22, 16  ;;  %v1511_v27 = vunpack.c.h.b16 %v1165_v22  ;;  %626 = vmatpush.bf16.msra.mxu0 %v617_v24  ;;  %647 = vmatpush.bf16.msra.mxu1 %v638_v25  ;;  %v536_v30 = vld [vmem:[#allocation2 + $0x8] sm:$0x3]  ;;  %v424_v31 = vunpack.c.l.b16 %v416_v29  ;;  %v429_v32 = vshrl.u32 %v1165_v22, 16  ;;  %v603_v55 = vld [vmem:[#allocation2] sm:$0xc]  ;;  %p1265_p1 = scmp.ne.s32.totalorder %s1263_s8, %s1264_s30  ;;  %p1270_p6 = scmp.lt.s32.totalorder %s1268_s19, %s1264_s30 }
  0x2d   : > { %v540_v36 = vunpack.c.l.b16 %v536_v30  ;;  %v607_v58 = vunpack.c.l.b16 %v603_v55  ;;  %v656_v63 = vld [vmem:[#allocation2 + $0x8] sm:$0x7]  ;;  %v723_v19 = vld [vmem:[#allocation2] sm:$0x8] }
  0x2e   : > { %v433_v33 = vrot.slane %v431_v26, 1  ;;  %v426_v34 = vpack.c.b16 %v424_v31, %v424_v31  ;;  %v488_v35 = vpack.c.b16 %v1511_v27, %v487_v28  ;;  %v660_v3 = vunpack.c.l.b16 %v656_v63  ;;  %v776_v28 = vld [vmem:[#allocation2 + $0x8] sm:$0xf]  ;;  %p1266_p2 = pnand %p1265_p1, %p1432_p3  ;;  %p1271_p7 = por %p1270_p6, %p1269_p5 }
  0x2f   : > { %v541_v44 = vpack.c.b16 %v540_v36, %v540_v36  ;;  %v608_v2 = vpack.c.b16 %v1511_v27, %v607_v58  ;;  %v727_v26 = vunpack.c.l.b16 %v723_v19 }
  0x30   : > { %v434_v37 = vor.u32 %v433_v33, %v429_v32  ;;  %v436_v38 = vshll.u32 %v426_v34, 16  ;;  %v490_v42 = vrot.slane %v488_v35, 1  ;;  %v491_v43 = vrot.slane %v426_v34, 1  ;;  %p1267_p4 = pneg %p1266_p2 }
  0x31   : > { %v544_v49 = vshrl.u32 %v488_v35, 16  ;;  %v547_v52 = vshll.u32 %v488_v35, 16  ;;  %v552_v53 = vshrl.u32 %v541_v44, 16  ;;  %v555_v54 = vshll.u32 %v541_v44, 16 }
  0x32   : > { %v438_v41 = vrot.slane %v436_v38, 1  ;;  %v492_v51 = vsel %vm489_vm4, %v490_v42, %v491_v43  ;;  %v610_v7 = vrot.slane %v608_v2, 2  ;;  %v611_v8 = vrot.slane %v541_v44, 2  ;;  %p1272_p9 = pnand %p1271_p7, %p1267_p4 }
  0x33   : > { %v546_v59 = vrot.slane %v544_v49, 1  ;;  %v549_v60 = vrot.slane %v547_v52, 2  ;;  %v554_v61 = vrot.slane %v552_v53, 1  ;;  %v557_v62 = vrot.slane %v555_v54, 2 }
  0x34   : > { %v439_v47 = vsel %vm427_vm3, %v434_v37, %v438_v41  ;;  %v661_v9 = vpack.c.b16 %v660_v3, %v660_v3  ;;  %v664_v13 = vshrl.u32 %v608_v2, 16  ;;  %v612_v15 = vsel %vm609_vm6, %v610_v7, %v611_v8 }
  0x35   : > { %1118 = vmatmul.msk.bf16.vlgmr.msra.gmra.mxu2 %vm364_vm2, %v439_v47  ;;  %1120 = vmatmul.msk.bf16.vlgmr.msra.gmra.mxu3 %vm364_vm2, %v439_v47  ;;  %v550_v0 = vor.u32 %v549_v60, %v546_v59  ;;  %v558_v1 = vor.u32 %v557_v62, %v554_v61  ;;  %v667_v16 = vshll.u32 %v608_v2, 16  ;;  %v728_v31 = vpack.c.b16 %v1511_v27, %v727_v26  ;;  %v1242_v61 = vld [vmem:[%s1666_s5] ss:$0 sm:$0xff] }
  0x36   : > { %693 = vmatpush.bf16.msra.mxu2 %v684_v45  ;;  %714 = vmatpush.bf16.msra.mxu3 %v705_v46  ;;  %v672_v17 = vshrl.u32 %v661_v9, 16  ;;  %v675_v18 = vshll.u32 %v661_v9, 16  ;;  %v666_v22 = vrot.slane %v664_v13, 2  ;;  %v780_v32 = vunpack.c.l.b16 %v776_v28 }
  0x37   : > { %v559_v6 = vsel %vm542_vm5, %v550_v0, %v558_v1  ;;  %v669_v23 = vrot.slane %v667_v16, 3  ;;  %v730_v34 = vrot.slane %v728_v31, 3  ;;  %v731_v35 = vrot.slane %v661_v9, 3 }
  0x38   : > { %v674_v24 = vrot.slane %v672_v17, 2  ;;  %v677_v25 = vrot.slane %v675_v18, 3  ;;  %v781_v36 = vpack.c.b16 %v780_v32, %v780_v32  ;;  %v784_v37 = vshrl.u32 %v728_v31, 16 }
  0x39   : > { %v670_v29 = vor.u32 %v669_v23, %v666_v22  ;;  %v732_v38 = vsel %vm729_vm8, %v730_v34, %v731_v35  ;;  %v787_v39 = vshll.u32 %v728_v31, 16  ;;  %v845_v49 = vpack.c.b16 %v780_v32, %v1511_v27 }
  0x3a   : > { %v678_v30 = vor.u32 %v677_v25, %v674_v24  ;;  %v792_v40 = vshrl.u32 %v781_v36, 16  ;;  %v795_v41 = vshll.u32 %v781_v36, 16  ;;  %v786_v42 = vrot.slane %v784_v37, 3 }
  0x3b   : > { %1122 = vmatmul.msk.bf16.vlgmr.msrb.gmra.mxu0 %vm364_vm2, %v492_v51  ;;  %1124 = vmatmul.msk.bf16.vlgmr.msrb.gmra.mxu1 %vm364_vm2, %v492_v51  ;;  %v789_v43 = vrot.slane %v787_v39, 4 }
  0x3c   : > { %746 = vmatpush.bf16.msrb.mxu0 %v737_v56  ;;  %767 = vmatpush.bf16.msrb.mxu1 %v758_v57  ;;  %v679_v33 = vsel %vm662_vm7, %v670_v29, %v678_v30  ;;  %v794_v44 = vrot.slane %v792_v40, 3  ;;  %v797_v45 = vrot.slane %v795_v41, 4 }
  0x3d   : > { %v790_v46 = vor.u32 %v789_v43, %v786_v42  ;;  %v1243_v43 = vld [vmem:[%s1665_s4] ss:$0 sm:$0xff] }
  0x3e   : > { %v798_v47 = vor.u32 %v797_v45, %v794_v44 }
  0x40   : > { %v799_v48 = vsel %vm782_vm9, %v790_v46, %v798_v47 }
  0x45   : > { %1126 = vmatmul.msk.bf16.vlgmr.msrb.gmra.mxu2 %vm364_vm2, %v559_v6  ;;  %1128 = vmatmul.msk.bf16.vlgmr.msrb.gmra.mxu3 %vm364_vm2, %v559_v6 }
  0x46   : > { %813 = vmatpush.bf16.msrb.mxu2 %v804_v10  ;;  %834 = vmatpush.bf16.msrb.mxu3 %v825_v11 }
  0x4b   : > { %1130 = vmatmul.msk.bf16.vlgmr.msra.gmra.mxu0 %vm364_vm2, %v612_v15  ;;  %1132 = vmatmul.msk.bf16.vlgmr.msra.gmra.mxu1 %vm364_vm2, %v612_v15 }
  0x4c   : > { %859 = vmatpush.bf16.msra.mxu0 %v850_v20  ;;  %880 = vmatpush.bf16.msra.mxu1 %v871_v21 }
  0x55   : > { %1134 = vmatmul.msk.bf16.vlgmr.msra.gmra.mxu2 %vm364_vm2, %v679_v33  ;;  %1136 = vmatmul.msk.bf16.vlgmr.msra.gmra.mxu3 %vm364_vm2, %v679_v33 }
  0x5b   : > { %1138 = vmatmul.msk.bf16.vlgmr.msrb.gmra.mxu0 %vm364_vm2, %v732_v38  ;;  %1140 = vmatmul.msk.bf16.vlgmr.msrb.gmra.mxu1 %vm364_vm2, %v732_v38 }
  0x65   : > { %1142 = vmatmul.msk.bf16.vlgmr.msrb.gmra.mxu2 %vm364_vm2, %v799_v48  ;;  %1144 = vmatmul.msk.bf16.vlgmr.msrb.gmra.mxu3 %vm364_vm2, %v799_v48 }
  0x6b   : > { %1146 = vmatmul.msk.bf16.vlgmr.msra.gmra.mxu0 %vm364_vm2, %v845_v49  ;;  %1148 = vmatmul.msk.bf16.vlgmr.msra.gmra.mxu1 %vm364_vm2, %v845_v49 }
  0xa8   : > { %v381_v50 = vpop.f32.mrf.mxu0  ;;  %v404_v58 = vpop.f32.mrf.mxu1 }
  0xa9   : > { %v389_v62 = vadd.f32 %v1242_v61, %v381_v50 }
  0xb0   : > { %v383_v51 = vpop.f32.mrf.mxu0  ;;  %v1568_v27 = vpop.f32.mrf.mxu1 }
  0xb1   : > { %v390_v4 = vadd.f32 %v1242_v61, %v383_v51  ;;  %v412_v51 = vadd.f32 %v1243_v43, %v404_v58 }
  0xb8   : > { %v508_v52 = vpop.f32.mrf.mxu0  ;;  %v455_v53 = vpop.f32.mrf.mxu2 }
  0xb9   : > { %v460_v0 = vadd.f32 %v455_v53, %v389_v62  ;;  %v476_v2 = vpop.f32.mrf.mxu3  ;;  %v529_v6 = vpop.f32.mrf.mxu1 }
  0xbb   : > { %v513_v3 = vadd.f32 %v508_v52, %v460_v0 }
  0xc0   : > { %v510_v54 = vpop.f32.mrf.mxu0  ;;  %v457_v55 = vpop.f32.mrf.mxu2 }
  0xc1   : > { %v461_v8 = vadd.f32 %v457_v55, %v390_v4  ;;  %v1570_v13 = vpop.f32.mrf.mxu3  ;;  %v1572_v17 = vpop.f32.mrf.mxu1 }
  0xc3   : > { %v514_v11 = vadd.f32 %v510_v54, %v461_v8 }
  0xc8   : > { %v628_v56 = vpop.f32.mrf.mxu0  ;;  %v575_v57 = vpop.f32.mrf.mxu2 }
  0xc9   : > { %v580_v5 = vadd.f32 %v575_v57, %v513_v3  ;;  %v596_v24 = vpop.f32.mrf.mxu3  ;;  %v649_v32 = vpop.f32.mrf.mxu1 }
  0xcb   : > { %v633_v10 = vadd.f32 %v628_v56, %v580_v5 }
  0xd0   : > { %v630_v59 = vpop.f32.mrf.mxu0  ;;  %v577_v60 = vpop.f32.mrf.mxu2 }
  0xd1   : > { %v581_v14 = vadd.f32 %v577_v60, %v514_v11  ;;  %v598_v41 = vpop.f32.mrf.mxu3  ;;  %v1593_v48 = vpop.f32.mrf.mxu1  ;;  %v481_v60 = vadd.f32 %v476_v2, %v412_v51  ;;  %v413_v2 = vadd.f32 %v1243_v43, %v1568_v27 }
  0xd3   : > { %v634_v19 = vadd.f32 %v630_v59, %v581_v14  ;;  %v534_v5 = vadd.f32 %v529_v6, %v481_v60  ;;  %v482_v6 = vadd.f32 %v1570_v13, %v413_v2 }
  0xd5   : > { %v535_v27 = vadd.f32 %v1572_v17, %v482_v6 }
  0xd7   : > { %v602_v13 = vadd.f32 %v598_v41, %v535_v27 }
  0xd8   : > { %v748_v63 = vpop.f32.mrf.mxu0  ;;  %v695_v1 = vpop.f32.mrf.mxu2 }
  0xd9   : > { %v700_v12 = vadd.f32 %v695_v1, %v633_v10  ;;  %v716_v62 = vpop.f32.mrf.mxu3 }
  0xdb   : > { %v753_v16 = vadd.f32 %v748_v63, %v700_v12  ;;  %v601_v12 = vadd.f32 %v596_v24, %v534_v5 }
  0xe0   : > { %v750_v7 = vpop.f32.mrf.mxu0  ;;  %v697_v9 = vpop.f32.mrf.mxu2 }
  0xe1   : > { %v701_v21 = vadd.f32 %v697_v9, %v634_v19 }
  0xe3   : > { %v754_v25 = vadd.f32 %v750_v7, %v701_v21  ;;  %v769_v7 = vpop.f32.mrf.mxu1  ;;  %v654_v21 = vadd.f32 %v649_v32, %v601_v12 }
  0xe5   : > { %v721_v24 = vadd.f32 %v716_v62, %v654_v21 }
  0xe7   : > { %v774_v43 = vadd.f32 %v769_v7, %v721_v24 }
  0xe8   : > { %v861_v15 = vpop.f32.mrf.mxu0  ;;  %v815_v18 = vpop.f32.mrf.mxu2 }
  0xe9   : > { %v820_v20 = vadd.f32 %v815_v18, %v753_v16  ;;  %v718_v18 = vpop.f32.mrf.mxu3 }
  0xeb   : > { %v1574_v22 = vadd.f32 %v861_v15, %v820_v20 }
  0xed   : > { %v1577_v23 = vmul.f32 0.70710677, %v1574_v22  ;;  %v889_v60 = vmul.f32 0.5, %v1574_v22 }
  0xef   : > { %v893_v26 = vmul.f32 %v1577_v23, %v1577_v23 }
  0xf0   : > { %v817_v28 = vpop.f32.mrf.mxu2  ;;  %v863_v29 = vpop.f32.mrf.mxu0 }
  0xf1   : > { %v894_v30 = vmin.f32 %v893_v26, 16.0  ;;  %v821_v31 = vadd.f32 %v817_v28, %v754_v25 }
  0xf3   : > { %v895_v33 = vmul.f32 2.1237322e-06, %v894_v30  ;;  %v906_v34 = vmul.f32 3.8918573e-05, %v894_v30  ;;  %v1581_v35 = vadd.f32 %v863_v29, %v821_v31  ;;  %v771_v31 = vpop.f32.mrf.mxu1 }
  0xf5   : > { %v896_v36 = vadd.f32 0.00028619796, %v895_v33  ;;  %v907_v37 = vadd.f32 0.001143296, %v906_v34  ;;  %v1584_v38 = vmul.f32 0.70710677, %v1581_v35 }
  0xf7   : > { %v897_v39 = vmul.f32 %v896_v36, %v894_v30  ;;  %v908_v40 = vmul.f32 %v907_v37, %v894_v30  ;;  %v933_v42 = vmul.f32 %v1584_v38, %v1584_v38 }
  0xf9   : > { %v909_v44 = vadd.f32 0.014752088, %v908_v40  ;;  %v898_v45 = vadd.f32 0.0036580483, %v897_v39  ;;  %v1591_v46 = vmin.f32 %v933_v42, 16.0 }
  0xfb   : > { %v910_v47 = vmul.f32 %v909_v44, %v894_v30  ;;  %v935_v49 = vmul.f32 2.1237322e-06, %v1591_v46  ;;  %v946_v50 = vmul.f32 3.8918573e-05, %v1591_v46  ;;  %v899_v53 = vmul.f32 %v898_v45, %v894_v30  ;;  %v836_v44 = vpop.f32.mrf.mxu3 }
  0xfd   : > { %v911_v52 = vadd.f32 0.112945676, %v910_v47  ;;  %v936_v54 = vadd.f32 0.00028619796, %v935_v49  ;;  %v947_v55 = vadd.f32 0.001143296, %v946_v50 }
  0xfe   : > { %v900_v63 = vadd.f32 0.05243302, %v899_v53  ;;  %v841_v53 = vadd.f32 %v836_v44, %v774_v43 }
  0xff   : > { %v912_v56 = vmul.f32 %v911_v52, %v894_v30  ;;  %v937_v57 = vmul.f32 %v936_v54, %v1591_v46  ;;  %v948_v59 = vmul.f32 %v947_v55, %v1591_v46  ;;  %v655_v52 = vadd.f32 %v1593_v48, %v602_v13  ;;  %v882_v54 = vpop.f32.mrf.mxu1 }
 0x100   : > { %v901_v8 = vmul.f32 %v900_v63, %v894_v30  ;;  %v887_v48 = vadd.f32 %v882_v54, %v841_v53 }
 0x101   : > { %v913_v61 = vadd.f32 0.4994258, %v912_v56  ;;  %v949_v0 = vadd.f32 0.014752088, %v948_v59  ;;  %v938_v3 = vadd.f32 0.0036580483, %v937_v57 }
 0x102   : > { %v902_v14 = vadd.f32 0.18741608, %v901_v8 }
 0x103   : > { %v914_v1 = vmul.f32 %v913_v61, %v894_v30  ;;  %v950_v4 = vmul.f32 %v949_v0, %v1591_v46  ;;  %v939_v10 = vmul.f32 %v938_v3, %v1591_v46  ;;  %v722_v61 = vadd.f32 %v718_v18, %v655_v52  ;;  %v838_v5 = vpop.f32.mrf.mxu3 }
 0x104   : > { %v903_v25 = vmul.f32 %v902_v14, %v894_v30 }
 0x105   : > { %v915_v58 = vadd.f32 1.0, %v914_v1  ;;  %v951_v9 = vadd.f32 0.112945676, %v950_v4  ;;  %v940_v16 = vadd.f32 0.05243302, %v939_v10  ;;  %v775_v22 = vadd.f32 %v771_v31, %v722_v61 }
 0x106   : > { %v904_v36 = vadd.f32 1.1283791, %v903_v25 }
 0x107   : > { %1244 = vrcp.f32 %v915_v58  ;;  %v952_v11 = vmul.f32 %v951_v9, %v1591_v46  ;;  %v941_v29 = vmul.f32 %v940_v16, %v1591_v46  ;;  %v927_v34 = vand.u32 2147483648, %v915_v58  ;;  %v884_v10 = vpop.f32.mrf.mxu1 }
 0x108   : > { %v925_v39 = vand.u32 2147483647, %v915_v58  ;;  %vm921_vm11 = vweird.f32 %v915_v58  ;;  %v905_v45 = vmul.f32 %v904_v36, %v1577_v23  ;;  %v842_v8 = vadd.f32 %v838_v5, %v775_v22 }
 0x109   : > { %v953_v15 = vadd.f32 0.4994258, %v952_v11  ;;  %v942_v40 = vadd.f32 0.18741608, %v941_v29  ;;  %v928_v30 = vor.u32 1.1754944e-38, %v927_v34 }
 0x10a   : > { %vm926_vm13 = vcmp.eq.f32.partialorder %v925_v39, 8.507059e+37  ;;  %v888_v2 = vadd.f32 %v884_v10, %v842_v8 }
 0x10b   : > { %v954_v19 = vmul.f32 %v953_v15, %v1591_v46  ;;  %v943_v49 = vmul.f32 %v942_v40, %v1591_v46 }
 0x10d   : > { %v1245_v20 = vpop.eup %1244  ;;  %v955_v28 = vadd.f32 1.0, %v954_v19  ;;  %v944_v57 = vadd.f32 1.1283791, %v943_v49 }
 0x10e   : > { %v917_v26 = vmul.f32 %v1245_v20, %v915_v58  ;;  %vm922_vm10 = vweird.f32 %v1245_v20 }
 0x10f   : > { %1246 = vrcp.f32 %v955_v28  ;;  %vm923_vm12 = vmor %vm921_vm11, %vm922_vm10  ;;  %v967_v56 = vand.u32 2147483648, %v955_v28  ;;  %v965_v59 = vand.u32 2147483647, %v955_v28  ;;  %vm961_vm15 = vweird.f32 %v955_v28 }
 0x110   : > { %v918_v33 = vsub.f32 1.0, %v917_v26  ;;  %v945_v1 = vmul.f32 %v944_v57, %v1584_v38  ;;  %v890_v38 = vmul.f32 0.5, %v1581_v35 }
 0x111   : > { %v968_v0 = vor.u32 1.1754944e-38, %v967_v56  ;;  %vm966_vm1 = vcmp.eq.f32.partialorder %v965_v59, 8.507059e+37 }
 0x112   : > { %v919_v37 = vmul.f32 %v1245_v20, %v918_v33 }
 0x114   : > { %v920_v42 = vadd.f32 %v1245_v20, %v919_v37 }
 0x115   : > { %v1247_v32 = vpop.eup %1246 }
 0x116   : > { %v924_v17 = vsel %vm923_vm12, %v1245_v20, %v920_v42  ;;  %v957_v50 = vmul.f32 %v1247_v32, %v955_v28  ;;  %vm962_vm14 = vweird.f32 %v1247_v32 }
 0x117   : > { %v929_v47 = vsel %vm926_vm13, %v928_v30, %v924_v17  ;;  %vm963_vm0 = vmor %vm961_vm15, %vm962_vm14 }
 0x118   : > { %v930_v51 = vmul.f32 %v929_v47, %v905_v45  ;;  %v958_v41 = vsub.f32 1.0, %v957_v50 }
 0x11a   : > { %v1149_v55 = vclamps-f32 %v930_v51, 1.0  ;;  %v959_v23 = vmul.f32 %v1247_v32, %v958_v41 }
 0x11c   : > { %v973_v46 = vadd.f32 1.0, %v1149_v55  ;;  %v960_v62 = vadd.f32 %v1247_v32, %v959_v23 }
 0x11e   : > { %v975_v63 = vmul.f32 %v973_v46, %v889_v60  ;;  %v964_v3 = vsel %vm963_vm0, %v1247_v32, %v960_v62 }
 0x11f   : > { %v969_v58 = vsel %vm966_vm1, %v968_v0, %v964_v3 }
 0x120   : > { %v977_v4 = vmul.f32 %v975_v63, %v887_v48  ;;  %v970_v7 = vmul.f32 %v969_v58, %v945_v1 }
 0x122   : > { %979 = vst [vmem:[%s314_s16] sm:$0xff] %v977_v4  ;;  %v1150_v9 = vclamps-f32 %v970_v7, 1.0 }
 0x124   : > { %v974_v11 = vadd.f32 1.0, %v1150_v9 }
 0x126   : > { %v976_v12 = vmul.f32 %v974_v11, %v890_v38 }
 0x128   : > { %v978_v14 = vmul.f32 %v976_v12, %v888_v2 }
 0x12a   : > { %980 = vst [vmem:[%s314_s16 + $0x8] sm:$0xff] %v978_v14 }
 0x12b   : > { %1275 = shalt.err (!%p1272_p9)
}
 0x12c   : > { %s1344_s18 = smov 128   ;;  %s1345_s25 = smov 8  }
 0x12d   : > { %1169 = dma.vmem_to_hbm [thread:$0]  (%p1432_p3), %s997_s14, 256, %s999_s27, %s982_s7, %s1344_s18, %s1344_s18, %s1345_s25  }
 0x12e PF: > { %p1175_p10 = scmp.ge.s32.totalorder %s1342_s28, 2  ;;  %s1013_s16 = sand.u32 1, %s1314_s21  }
 0x12f   : > { %s1014_s20 = scalar_lea.sflag [#allocation4], %s1013_s16 }
 0x130   : > { %p1172_p11 = pnand %p1175_p10, %p1441_p8 }
 0x132   : > { %p1173_p12 = pneg %p1172_p11 }
 0x134   : > { %1309 = dma.done.wait (%p1173_p12), %s1014_s20, 256  }
 0x135   : > { %1311 = vsyncadd (%p1173_p12), %s1014_s20, 4294967040  ;;  %s19_s28 = sadd.s32 1, %s1342_s28   ;;  %s1676_s25 = sld [smem:[#allocation6_spill]] }
 0x136   : > { %p16_p13 = scmp.ge.s32.totalorder %s19_s28, 10   ;;  %s1677_s10 = sld [smem:[#allocation7_spill]] }
 0x137   : > { %s1678_s27 = sld [smem:[#allocation8_spill]]  ;;  %s1679_s21 = smov %s1318_s22 }
 0x138   : > { %s1680_s22 = smov %s1322_s23  ;;  %s1681_s23 = smov %s1450_s15 }
 0x139   : > { %s1682_s24 = smov %s1334_s26  ;;  %18 = sbr.rel (!%p16_p13) target bundleno = 5 (0x5), region = 98 }
 0x13c   : > { %s1683_s26 = smov %s1677_s10 }
 0x13e   :  { %1020 = vsyncpa [#allocation4], 1 }
 0x13f   :  { %1022 = vsyncpa [#allocation4 + $0x1], 1 }

// kernel: tpu_custom_call.1
= control target key start
LH: loop header
LB: loop body
LE: loop exit
PB: predicated region body
PF: predicated region fallthrough
CT: control target
= control target key end

     0   :  { %11 = vsyncpa [#allocation4], 0  ;;  %s1661_s0 = inlined_call_operand.vmem [shape: bf16[2,72,8], index: 0, kind: input, shape index: {}]   ;;  %s1662_s1 = inlined_call_operand.vmem [shape: bf16[2,72,8], index: 1, kind: input, shape index: {}]   ;;  %s1663_s2 = inlined_call_operand.vmem [shape: bf16[9,8,128], index: 2, kind: input, shape index: {}]   ;;  %s1664_s3 = inlined_call_operand.vmem [shape: bf16[9,8,128], index: 3, kind: input, shape index: {}]   ;;  %s1665_s4 = inlined_call_operand.vmem [shape: f32[1,128], index: 4, kind: input, shape index: {}]   ;;  %s1666_s5 = inlined_call_operand.vmem [shape: f32[1,128], index: 5, kind: input, shape index: {}]   ;;  %s1667_s6 = inlined_call_operand.hbm [shape: f32[2,64,128], index: 6, kind: output, shape index: {}]  }
   0x1   :  { %13 = vsyncpa [#allocation4 + $0x1], 0  ;;  %s1381_s21 = smov 0   ;;  %s1383_s22 = smov 0  }
   0x2   :  { %s1385_s23 = smov 0   ;;  %s1387_s24 = smov 0  }
   0x3   :  { %s1389_s25 = smov 0   ;;  %s1391_s26 = smov 0  }
   0x4   :  { %s1393_s27 = smov 0   ;;  %s1395_s28 = smov 0  }
   0x5 LB: > { %1671 = sst [smem:[#allocation6_spill]] %s1338_s27  ;;  %s1099_s29 = sadd.s32 4294967295, %s1342_s28   ;;  %s1342_s28 = sphi %s1395_s28, %s19_s28   ;;  %s1338_s27 = sphi %s1393_s27, %s1678_s27   ;;  %s1334_s26 = sphi %s1391_s26, %s1683_s26   ;;  %s1330_s25 = sphi %s1389_s25, %s1676_s25   ;;  %s1326_s24 = sphi %s1387_s24, %s1682_s24   ;;  %s1322_s23 = sphi %s1385_s23, %s1681_s23   ;;  %s1318_s22 = sphi %s1383_s22, %s1680_s22   ;;  %s1314_s21 = sphi %s1381_s21, %s1679_s21  }
   0x6   : > { %s1100_s30 = sadd.s32 4294967294, %s1342_s28   ;;  %s28_s7 = sadd.s32 1, %s1334_s26 }
   0x7   : > { %p29_p0 = scmp.ge.s32.totalorder %s28_s7, 4  ;;  %s31_s8 = sadd.s32 1, %s1338_s27 }
   0x8   : > { %p194_p1 = scmp.ne.s32.totalorder %s1322_s23, %s1318_s22  ;;  %p195_p2 = scmp.eq.s32.totalorder %s1099_s29, 7 }
   0x9   : > { %s1685_s7 = smov (%p29_p0, %s28_s7), 0  ;;  %s1687_s8 = smov (!%p29_p0, %s31_s8), %s1338_s27 }
   0xa   : > { %1672 = sst [smem:[#allocation7_spill]] %s1685_s7  ;;  %s180_s9 = ssub.s32 %s1334_s26, %s1685_s7 }
   0xb   : > { %p1432_p3 = por %p195_p2, %p194_p1  ;;  %p33_p4 = scmp.ge.s32.totalorder %s1687_s8, 2 }
   0xc   : > { %p200_p5 = scmp.ne.s32.totalorder %s1318_s22, %s1314_s21  ;;  %p201_p6 = scmp.eq.s32.totalorder %s1100_s30, 7 }
   0xd   : > { %p1105_p7 = scmp.ge.s32.totalorder %s1342_s28, 1  ;;  %s1689_s8 = smov (%p33_p4, %s1687_s8), 0 }
   0xe   : > { %1674 = sst [smem:[#allocation8_spill]] %s1689_s8  ;;  %p1441_p8 = por %p201_p6, %p200_p5 }
   0xf   : > { %p267_p9 = scmp.lt.s32.totalorder %s1342_s28, 9  ;;  %s179_s12 = ssub.s32 %s1338_s27, %s1689_s8 }
  0x10   : > { %s184_s13 = sadd.s32 1, %s1322_s23  ;;  %s181_s14 = sor.u32 %s180_s9, %s179_s12 }
  0x11   : > { %p268_p10 = pnand %p1105_p7, %p267_p9  ;;  %p182_p11 = scmp.eq.s32.totalorder %s181_s14, 0 }
  0x12   : > { %s1459_s20 = sshll.u32 (!%p268_p10), %s1326_s24, 1  ;;  %p320_p12 = scmp.lt.s32.totalorder (!%p268_p10), %s1330_s25, 1 }
  0x13   : > { %s1450_s15 = scalar_select %p182_p11, %s1322_s23, %s184_s13  }
  0x14   : > { %271 = sbr.rel (%p268_p10) target bundleno = 302 (0x12e), region = 44  ;;  %p322_p13 = scmp.lt.s32.totalorder (!%p268_p10), %s1459_s20, 8 }
  0x15   : > { %s1162_s9 = sadd.s32 (!%p268_p10), 2, %s1459_s20  ;;  %s312_s18 = sand.u32 (!%p268_p10), 1, %s1318_s22  }
  0x16   : > { %p337_p0 = scmp.lt.s32.totalorder (!%p268_p10), %s1162_s9, 8  ;;  %s982_s7 = scalar_lea.sflag (!%p268_p10), [#allocation4], %s312_s18 }
  0x19   : > { %v358_v0 = vld [vmem:[%s1664_s3] sm:$0xf]  ;;  %vm368_vm0 = vcmask 1043456   ;;  %v1121_v4 = vld [vmem:[%s1664_s3 + $0x8] sm:$0xf]  ;;  %s1475_s14 = scalar_select %p320_p12, %s1330_s25, 1 }
  0x1a   : > { %v391_v1 = vld [vmem:[%s1663_s2] sm:$0xf]  ;;  %v370_v2 = vsel %vm368_vm0, %v358_v0, 0  ;;  %v1117_v5 = vld [vmem:[%s1664_s3 + $0x4] sm:$0xf]  ;;  %v497_v7 = vsel %vm368_vm0, %v1121_v4, 0 }
  0x1b   : > { %v393_v3 = vsel %vm368_vm0, %v391_v1, 0  ;;  %379 = vmatpush.bf16.msra.mxu0 %v370_v2  ;;  %v1119_v6 = vld [vmem:[%s1663_s2 + $0x4] sm:$0xf]  ;;  %v444_v8 = vsel %vm368_vm0, %v1117_v5, 0  ;;  %s323_s16 = scalar_select %p322_p13, %s1459_s20, 8  ;;  %vm349_vm1 = vcmask 60416  }
  0x1c   : > { %402 = vmatpush.bf16.msra.mxu1 %v393_v3  ;;  %v465_v9 = vsel %vm368_vm0, %v1119_v6, 0  ;;  %453 = vmatpush.bf16.msra.mxu2 %v444_v8  ;;  %v1125_v10 = vld [vmem:[%s1664_s3 + $0xc] sm:$0xf]  ;;  %v1123_v11 = vld [vmem:[%s1663_s2 + $0x8] sm:$0xf]  ;;  %s1168_s30 = smul.u32 9, %s1475_s14 }
  0x1d   : > { %474 = vmatpush.bf16.msra.mxu3 %v465_v9  ;;  %v564_v12 = vsel %vm368_vm0, %v1125_v10, 0  ;;  %v518_v13 = vsel %vm368_vm0, %v1123_v11, 0  ;;  %v1127_v14 = vld [vmem:[%s1663_s2 + $0xc] sm:$0xf]  ;;  %s1691_s9 = smov (!%p337_p0, %s1162_s9), 8  ;;  %vm364_vm2 = vcmask 64512  }
  0x1e   : > { %s325_s13 = sadd.s32 %s1168_s30, %s323_s16  ;;  %v585_v15 = vsel %vm368_vm0, %v1127_v14, 0  ;;  %s340_s29 = sadd.s32 %s1168_s30, %s1691_s9  ;;  %v1129_v19 = vld [vmem:[%s1664_s3 + $0x10] sm:$0xf]  ;;  %v1133_v39 = vld [vmem:[%s1664_s3 + $0x14] sm:$0xf]  ;;  %vm489_vm4 = vcmask 1046528  }
  0x1f   : > { %506 = vmatpush.bf16.msrb.mxu0 %v497_v7  ;;  %s1108_s17 = sshll.u32 %s325_s13, 2  ;;  %s1110_s8 = sshll.u32 %s340_s29, 2  ;;  %v1131_v20 = vld [vmem:[%s1663_s2 + $0x10] sm:$0xf]  ;;  %v617_v24 = vsel %vm368_vm0, %v1129_v19, 0  ;;  %v684_v45 = vsel %vm368_vm0, %v1133_v39, 0 }
  0x20   : > { %573 = vmatpush.bf16.msrb.mxu2 %v564_v12  ;;  %527 = vmatpush.bf16.msrb.mxu1 %v518_v13  ;;  %s327_s19 = scalar_lea.vmem %s1661_s0, %s1108_s17  ;;  %s342_s16 = scalar_lea.vmem %s1662_s1, %s1110_s8  ;;  %v638_v25 = vsel %vm368_vm0, %v1131_v20, 0  ;;  %v1135_v40 = vld [vmem:[%s1663_s2 + $0x14] sm:$0xf]  ;;  %vm427_vm3 = vsmask.f32 7424  ;;  %vm609_vm6 = vcmask 1045504  }
  0x21   : > { %594 = vmatpush.bf16.msrb.mxu3 %v585_v15  ;;  %v347_v16 = vld [vmem:[%s327_s19] sm:$0xf]  ;;  %v348_v17 = vld [vmem:[%s327_s19 + $0x4] sm:$0xf]  ;;  %v705_v46 = vsel %vm368_vm0, %v1135_v40, 0  ;;  %vm729_vm8 = vcmask 1044480  }
  0x22   : > { %350 = vst.msk [vmem:[#allocation2] sm:$0xf] %vm349_vm1, %v347_v16  ;;  %v352_v18 = vld [vmem:[%s342_s16] sm:$0xf]  ;;  %v1137_v48 = vld [vmem:[%s1664_s3 + $0x18] sm:$0xf] }
  0x23   : > { %351 = vst.msk [vmem:[#allocation2 + $0x4] sm:$0xf] %vm349_vm1, %v348_v17  ;;  %v1139_v50 = vld [vmem:[%s1663_s2 + $0x18] sm:$0xf]  ;;  %v737_v56 = vsel %vm368_vm0, %v1137_v48, 0  ;;  %s1153_s19 = sshll.u32 %s1330_s25, 3 }
  0x24   : > { %353 = vst.msk [vmem:[#allocation2 + $0x8] sm:$0xf] %vm349_vm1, %v352_v18  ;;  %v758_v57 = vsel %vm368_vm0, %v1139_v50, 0  ;;  %vm542_vm5 = vsmask.f32 6400  ;;  %s1106_s29 = sshll.u32 %s312_s18, 4  ;;  %s993_s12 = sadd.s32 %s1153_s19, %s1459_s20 }
  0x25   : > { %v1141_v4 = vld [vmem:[%s1664_s3 + $0x1c] sm:$0xf]  ;;  %v1145_v12 = vld [vmem:[%s1664_s3 + $0x20] sm:$0xf]  ;;  %vm662_vm7 = vsmask.f32 5376 }
  0x26   : > { %v1143_v5 = vld [vmem:[%s1663_s2 + $0x1c] sm:$0xf]  ;;  %v804_v10 = vsel %vm368_vm0, %v1141_v4, 0  ;;  %v1147_v14 = vld [vmem:[%s1663_s2 + $0x20] sm:$0xf]  ;;  %v850_v20 = vsel %vm368_vm0, %v1145_v12, 0 }
  0x27   : > { %v825_v11 = vsel %vm368_vm0, %v1143_v5, 0  ;;  %vm782_vm9 = vsmask.f32 4352  ;;  %s1154_s25 = sshll.u32 %s993_s12, 3  ;;  %s314_s16 = scalar_lea.vmem [#allocation3], %s1106_s29 }
  0x28   : > { %s995_s13 = scalar_lea.hbm %s1667_s6, %s1154_s25  ;;  %s996_s14 = sshll.u32 %s314_s16, 4  ;;  %s997_s14 = int_to_ptr.vmem [resolvable:$true] %s996_s14 }
  0x29   : > { %v483_v23 = vld [vmem:[#allocation2] sm:$0xe]  ;;  %s998_s27 = sshll.u32 %s995_s13, 4  ;;  %s1268_s19 = scalar_lea.hbm %s1667_s6, 128  ;;  %s999_s27 = int_to_ptr.hbm [resolvable:$true] %s998_s27 }
  0x2a   : > { %v1163_v21 = vld [vmem:[#allocation2] sm:$0xff]  ;;  %v487_v28 = vunpack.c.l.b16 %v483_v23  ;;  %s1262_s8 = sshra.s32 %s999_s27, 4  ;;  %s1263_s8 = int_to_ptr.hbm [resolvable:$true] %s1262_s8 }
  0x2b   : > { %v1165_v22 = vld [vmem:[#allocation2] sm:$0xff]   ;;  %1115 = vmatmul.msk.bf16.vlgmr.msra.gmra.mxu0 %vm364_vm2, %v1163_v21  ;;  %1116 = vmatmul.msk.bf16.vlgmr.msra.gmra.mxu1 %vm364_vm2, %v1163_v21  ;;  %v416_v29 = vld [vmem:[#allocation2 + $0x8] sm:$0x1]  ;;  %v871_v21 = vsel %vm368_vm0, %v1147_v14, 0  ;;  %s1264_s30 = scalar_lea.hbm %s1263_s8, 16  ;;  %p1269_p5 = scmp.lt.s32.totalorder %s1263_s8, %s1667_s6 }
  0x2c   : > { %v431_v26 = vshll.u32 %v1165_v22, 16  ;;  %v1511_v27 = vunpack.c.h.b16 %v1165_v22  ;;  %626 = vmatpush.bf16.msra.mxu0 %v617_v24  ;;  %647 = vmatpush.bf16.msra.mxu1 %v638_v25  ;;  %v536_v30 = vld [vmem:[#allocation2 + $0x8] sm:$0x3]  ;;  %v424_v31 = vunpack.c.l.b16 %v416_v29  ;;  %v429_v32 = vshrl.u32 %v1165_v22, 16  ;;  %v603_v55 = vld [vmem:[#allocation2] sm:$0xc]  ;;  %p1265_p1 = scmp.ne.s32.totalorder %s1263_s8, %s1264_s30  ;;  %p1270_p6 = scmp.lt.s32.totalorder %s1268_s19, %s1264_s30 }
  0x2d   : > { %v540_v36 = vunpack.c.l.b16 %v536_v30  ;;  %v607_v58 = vunpack.c.l.b16 %v603_v55  ;;  %v656_v63 = vld [vmem:[#allocation2 + $0x8] sm:$0x7]  ;;  %v723_v19 = vld [vmem:[#allocation2] sm:$0x8] }
  0x2e   : > { %v433_v33 = vrot.slane %v431_v26, 1  ;;  %v426_v34 = vpack.c.b16 %v424_v31, %v424_v31  ;;  %v488_v35 = vpack.c.b16 %v1511_v27, %v487_v28  ;;  %v660_v3 = vunpack.c.l.b16 %v656_v63  ;;  %v776_v28 = vld [vmem:[#allocation2 + $0x8] sm:$0xf]  ;;  %p1266_p2 = pnand %p1265_p1, %p1432_p3  ;;  %p1271_p7 = por %p1270_p6, %p1269_p5 }
  0x2f   : > { %v541_v44 = vpack.c.b16 %v540_v36, %v540_v36  ;;  %v608_v2 = vpack.c.b16 %v1511_v27, %v607_v58  ;;  %v727_v26 = vunpack.c.l.b16 %v723_v19 }
  0x30   : > { %v434_v37 = vor.u32 %v433_v33, %v429_v32  ;;  %v436_v38 = vshll.u32 %v426_v34, 16  ;;  %v490_v42 = vrot.slane %v488_v35, 1  ;;  %v491_v43 = vrot.slane %v426_v34, 1  ;;  %p1267_p4 = pneg %p1266_p2 }
  0x31   : > { %v544_v49 = vshrl.u32 %v488_v35, 16  ;;  %v547_v52 = vshll.u32 %v488_v35, 16  ;;  %v552_v53 = vshrl.u32 %v541_v44, 16  ;;  %v555_v54 = vshll.u32 %v541_v44, 16 }
  0x32   : > { %v438_v41 = vrot.slane %v436_v38, 1  ;;  %v492_v51 = vsel %vm489_vm4, %v490_v42, %v491_v43  ;;  %v610_v7 = vrot.slane %v608_v2, 2  ;;  %v611_v8 = vrot.slane %v541_v44, 2  ;;  %p1272_p9 = pnand %p1271_p7, %p1267_p4 }
  0x33   : > { %v546_v59 = vrot.slane %v544_v49, 1  ;;  %v549_v60 = vrot.slane %v547_v52, 2  ;;  %v554_v61 = vrot.slane %v552_v53, 1  ;;  %v557_v62 = vrot.slane %v555_v54, 2 }
  0x34   : > { %v439_v47 = vsel %vm427_vm3, %v434_v37, %v438_v41  ;;  %v661_v9 = vpack.c.b16 %v660_v3, %v660_v3  ;;  %v664_v13 = vshrl.u32 %v608_v2, 16  ;;  %v612_v15 = vsel %vm609_vm6, %v610_v7, %v611_v8 }
  0x35   : > { %1118 = vmatmul.msk.bf16.vlgmr.msra.gmra.mxu2 %vm364_vm2, %v439_v47  ;;  %1120 = vmatmul.msk.bf16.vlgmr.msra.gmra.mxu3 %vm364_vm2, %v439_v47  ;;  %v550_v0 = vor.u32 %v549_v60, %v546_v59  ;;  %v558_v1 = vor.u32 %v557_v62, %v554_v61  ;;  %v667_v16 = vshll.u32 %v608_v2, 16  ;;  %v728_v31 = vpack.c.b16 %v1511_v27, %v727_v26  ;;  %v1242_v61 = vld [vmem:[%s1666_s5] ss:$0 sm:$0xff] }
  0x36   : > { %693 = vmatpush.bf16.msra.mxu2 %v684_v45  ;;  %714 = vmatpush.bf16.msra.mxu3 %v705_v46  ;;  %v672_v17 = vshrl.u32 %v661_v9, 16  ;;  %v675_v18 = vshll.u32 %v661_v9, 16  ;;  %v666_v22 = vrot.slane %v664_v13, 2  ;;  %v780_v32 = vunpack.c.l.b16 %v776_v28 }
  0x37   : > { %v559_v6 = vsel %vm542_vm5, %v550_v0, %v558_v1  ;;  %v669_v23 = vrot.slane %v667_v16, 3  ;;  %v730_v34 = vrot.slane %v728_v31, 3  ;;  %v731_v35 = vrot.slane %v661_v9, 3 }
  0x38   : > { %v674_v24 = vrot.slane %v672_v17, 2  ;;  %v677_v25 = vrot.slane %v675_v18, 3  ;;  %v781_v36 = vpack.c.b16 %v780_v32, %v780_v32  ;;  %v784_v37 = vshrl.u32 %v728_v31, 16 }
  0x39   : > { %v670_v29 = vor.u32 %v669_v23, %v666_v22  ;;  %v732_v38 = vsel %vm729_vm8, %v730_v34, %v731_v35  ;;  %v787_v39 = vshll.u32 %v728_v31, 16  ;;  %v845_v49 = vpack.c.b16 %v780_v32, %v1511_v27 }
  0x3a   : > { %v678_v30 = vor.u32 %v677_v25, %v674_v24  ;;  %v792_v40 = vshrl.u32 %v781_v36, 16  ;;  %v795_v41 = vshll.u32 %v781_v36, 16  ;;  %v786_v42 = vrot.slane %v784_v37, 3 }
  0x3b   : > { %1122 = vmatmul.msk.bf16.vlgmr.msrb.gmra.mxu0 %vm364_vm2, %v492_v51  ;;  %1124 = vmatmul.msk.bf16.vlgmr.msrb.gmra.mxu1 %vm364_vm2, %v492_v51  ;;  %v789_v43 = vrot.slane %v787_v39, 4 }
  0x3c   : > { %746 = vmatpush.bf16.msrb.mxu0 %v737_v56  ;;  %767 = vmatpush.bf16.msrb.mxu1 %v758_v57  ;;  %v679_v33 = vsel %vm662_vm7, %v670_v29, %v678_v30  ;;  %v794_v44 = vrot.slane %v792_v40, 3  ;;  %v797_v45 = vrot.slane %v795_v41, 4 }
  0x3d   : > { %v790_v46 = vor.u32 %v789_v43, %v786_v42  ;;  %v1243_v43 = vld [vmem:[%s1665_s4] ss:$0 sm:$0xff] }
  0x3e   : > { %v798_v47 = vor.u32 %v797_v45, %v794_v44 }
  0x40   : > { %v799_v48 = vsel %vm782_vm9, %v790_v46, %v798_v47 }
  0x45   : > { %1126 = vmatmul.msk.bf16.vlgmr.msrb.gmra.mxu2 %vm364_vm2, %v559_v6  ;;  %1128 = vmatmul.msk.bf16.vlgmr.msrb.gmra.mxu3 %vm364_vm2, %v559_v6 }
  0x46   : > { %813 = vmatpush.bf16.msrb.mxu2 %v804_v10  ;;  %834 = vmatpush.bf16.msrb.mxu3 %v825_v11 }
  0x4b   : > { %1130 = vmatmul.msk.bf16.vlgmr.msra.gmra.mxu0 %vm364_vm2, %v612_v15  ;;  %1132 = vmatmul.msk.bf16.vlgmr.msra.gmra.mxu1 %vm364_vm2, %v612_v15 }
  0x4c   : > { %859 = vmatpush.bf16.msra.mxu0 %v850_v20  ;;  %880 = vmatpush.bf16.msra.mxu1 %v871_v21 }
  0x55   : > { %1134 = vmatmul.msk.bf16.vlgmr.msra.gmra.mxu2 %vm364_vm2, %v679_v33  ;;  %1136 = vmatmul.msk.bf16.vlgmr.msra.gmra.mxu3 %vm364_vm2, %v679_v33 }
  0x5b   : > { %1138 = vmatmul.msk.bf16.vlgmr.msrb.gmra.mxu0 %vm364_vm2, %v732_v38  ;;  %1140 = vmatmul.msk.bf16.vlgmr.msrb.gmra.mxu1 %vm364_vm2, %v732_v38 }
  0x65   : > { %1142 = vmatmul.msk.bf16.vlgmr.msrb.gmra.mxu2 %vm364_vm2, %v799_v48  ;;  %1144 = vmatmul.msk.bf16.vlgmr.msrb.gmra.mxu3 %vm364_vm2, %v799_v48 }
  0x6b   : > { %1146 = vmatmul.msk.bf16.vlgmr.msra.gmra.mxu0 %vm364_vm2, %v845_v49  ;;  %1148 = vmatmul.msk.bf16.vlgmr.msra.gmra.mxu1 %vm364_vm2, %v845_v49 }
  0xa8   : > { %v381_v50 = vpop.f32.mrf.mxu0  ;;  %v404_v58 = vpop.f32.mrf.mxu1 }
  0xa9   : > { %v389_v62 = vadd.f32 %v1242_v61, %v381_v50 }
  0xb0   : > { %v383_v51 = vpop.f32.mrf.mxu0  ;;  %v1568_v27 = vpop.f32.mrf.mxu1 }
  0xb1   : > { %v390_v4 = vadd.f32 %v1242_v61, %v383_v51  ;;  %v412_v51 = vadd.f32 %v1243_v43, %v404_v58 }
  0xb8   : > { %v508_v52 = vpop.f32.mrf.mxu0  ;;  %v455_v53 = vpop.f32.mrf.mxu2 }
  0xb9   : > { %v460_v0 = vadd.f32 %v455_v53, %v389_v62  ;;  %v476_v2 = vpop.f32.mrf.mxu3  ;;  %v529_v6 = vpop.f32.mrf.mxu1 }
  0xbb   : > { %v513_v3 = vadd.f32 %v508_v52, %v460_v0 }
  0xc0   : > { %v510_v54 = vpop.f32.mrf.mxu0  ;;  %v457_v55 = vpop.f32.mrf.mxu2 }
  0xc1   : > { %v461_v8 = vadd.f32 %v457_v55, %v390_v4  ;;  %v1570_v13 = vpop.f32.mrf.mxu3  ;;  %v1572_v17 = vpop.f32.mrf.mxu1 }
  0xc3   : > { %v514_v11 = vadd.f32 %v510_v54, %v461_v8 }
  0xc8   : > { %v628_v56 = vpop.f32.mrf.mxu0  ;;  %v575_v57 = vpop.f32.mrf.mxu2 }
  0xc9   : > { %v580_v5 = vadd.f32 %v575_v57, %v513_v3  ;;  %v596_v24 = vpop.f32.mrf.mxu3  ;;  %v649_v32 = vpop.f32.mrf.mxu1 }
  0xcb   : > { %v633_v10 = vadd.f32 %v628_v56, %v580_v5 }
  0xd0   : > { %v630_v59 = vpop.f32.mrf.mxu0  ;;  %v577_v60 = vpop.f32.mrf.mxu2 }
  0xd1   : > { %v581_v14 = vadd.f32 %v577_v60, %v514_v11  ;;  %v598_v41 = vpop.f32.mrf.mxu3  ;;  %v1593_v48 = vpop.f32.mrf.mxu1  ;;  %v481_v60 = vadd.f32 %v476_v2, %v412_v51  ;;  %v413_v2 = vadd.f32 %v1243_v43, %v1568_v27 }
  0xd3   : > { %v634_v19 = vadd.f32 %v630_v59, %v581_v14  ;;  %v534_v5 = vadd.f32 %v529_v6, %v481_v60  ;;  %v482_v6 = vadd.f32 %v1570_v13, %v413_v2 }
  0xd5   : > { %v535_v27 = vadd.f32 %v1572_v17, %v482_v6 }
  0xd7   : > { %v602_v13 = vadd.f32 %v598_v41, %v535_v27 }
  0xd8   : > { %v748_v63 = vpop.f32.mrf.mxu0  ;;  %v695_v1 = vpop.f32.mrf.mxu2 }
  0xd9   : > { %v700_v12 = vadd.f32 %v695_v1, %v633_v10  ;;  %v716_v62 = vpop.f32.mrf.mxu3 }
  0xdb   : > { %v753_v16 = vadd.f32 %v748_v63, %v700_v12  ;;  %v601_v12 = vadd.f32 %v596_v24, %v534_v5 }
  0xe0   : > { %v750_v7 = vpop.f32.mrf.mxu0  ;;  %v697_v9 = vpop.f32.mrf.mxu2 }
  0xe1   : > { %v701_v21 = vadd.f32 %v697_v9, %v634_v19 }
  0xe3   : > { %v754_v25 = vadd.f32 %v750_v7, %v701_v21  ;;  %v769_v7 = vpop.f32.mrf.mxu1  ;;  %v654_v21 = vadd.f32 %v649_v32, %v601_v12 }
  0xe5   : > { %v721_v24 = vadd.f32 %v716_v62, %v654_v21 }
  0xe7   : > { %v774_v43 = vadd.f32 %v769_v7, %v721_v24 }
  0xe8   : > { %v861_v15 = vpop.f32.mrf.mxu0  ;;  %v815_v18 = vpop.f32.mrf.mxu2 }
  0xe9   : > { %v820_v20 = vadd.f32 %v815_v18, %v753_v16  ;;  %v718_v18 = vpop.f32.mrf.mxu3 }
  0xeb   : > { %v1574_v22 = vadd.f32 %v861_v15, %v820_v20 }
  0xed   : > { %v1577_v23 = vmul.f32 0.70710677, %v1574_v22  ;;  %v889_v60 = vmul.f32 0.5, %v1574_v22 }
  0xef   : > { %v893_v26 = vmul.f32 %v1577_v23, %v1577_v23 }
  0xf0   : > { %v817_v28 = vpop.f32.mrf.mxu2  ;;  %v863_v29 = vpop.f32.mrf.mxu0 }
  0xf1   : > { %v894_v30 = vmin.f32 %v893_v26, 16.0  ;;  %v821_v31 = vadd.f32 %v817_v28, %v754_v25 }
  0xf3   : > { %v895_v33 = vmul.f32 2.1237322e-06, %v894_v30  ;;  %v906_v34 = vmul.f32 3.8918573e-05, %v894_v30  ;;  %v1581_v35 = vadd.f32 %v863_v29, %v821_v31  ;;  %v771_v31 = vpop.f32.mrf.mxu1 }
  0xf5   : > { %v896_v36 = vadd.f32 0.00028619796, %v895_v33  ;;  %v907_v37 = vadd.f32 0.001143296, %v906_v34  ;;  %v1584_v38 = vmul.f32 0.70710677, %v1581_v35 }
  0xf7   : > { %v897_v39 = vmul.f32 %v896_v36, %v894_v30  ;;  %v908_v40 = vmul.f32 %v907_v37, %v894_v30  ;;  %v933_v42 = vmul.f32 %v1584_v38, %v1584_v38 }
  0xf9   : > { %v909_v44 = vadd.f32 0.014752088, %v908_v40  ;;  %v898_v45 = vadd.f32 0.0036580483, %v897_v39  ;;  %v1591_v46 = vmin.f32 %v933_v42, 16.0 }
  0xfb   : > { %v910_v47 = vmul.f32 %v909_v44, %v894_v30  ;;  %v935_v49 = vmul.f32 2.1237322e-06, %v1591_v46  ;;  %v946_v50 = vmul.f32 3.8918573e-05, %v1591_v46  ;;  %v899_v53 = vmul.f32 %v898_v45, %v894_v30  ;;  %v836_v44 = vpop.f32.mrf.mxu3 }
  0xfd   : > { %v911_v52 = vadd.f32 0.112945676, %v910_v47  ;;  %v936_v54 = vadd.f32 0.00028619796, %v935_v49  ;;  %v947_v55 = vadd.f32 0.001143296, %v946_v50 }
  0xfe   : > { %v900_v63 = vadd.f32 0.05243302, %v899_v53  ;;  %v841_v53 = vadd.f32 %v836_v44, %v774_v43 }
  0xff   : > { %v912_v56 = vmul.f32 %v911_v52, %v894_v30  ;;  %v937_v57 = vmul.f32 %v936_v54, %v1591_v46  ;;  %v948_v59 = vmul.f32 %v947_v55, %v1591_v46  ;;  %v655_v52 = vadd.f32 %v1593_v48, %v602_v13  ;;  %v882_v54 = vpop.f32.mrf.mxu1 }
 0x100   : > { %v901_v8 = vmul.f32 %v900_v63, %v894_v30  ;;  %v887_v48 = vadd.f32 %v882_v54, %v841_v53 }
 0x101   : > { %v913_v61 = vadd.f32 0.4994258, %v912_v56  ;;  %v949_v0 = vadd.f32 0.014752088, %v948_v59  ;;  %v938_v3 = vadd.f32 0.0036580483, %v937_v57 }
 0x102   : > { %v902_v14 = vadd.f32 0.18741608, %v901_v8 }
 0x103   : > { %v914_v1 = vmul.f32 %v913_v61, %v894_v30  ;;  %v950_v4 = vmul.f32 %v949_v0, %v1591_v46  ;;  %v939_v10 = vmul.f32 %v938_v3, %v1591_v46  ;;  %v722_v61 = vadd.f32 %v718_v18, %v655_v52  ;;  %v838_v5 = vpop.f32.mrf.mxu3 }
 0x104   : > { %v903_v25 = vmul.f32 %v902_v14, %v894_v30 }
 0x105   : > { %v915_v58 = vadd.f32 1.0, %v914_v1  ;;  %v951_v9 = vadd.f32 0.112945676, %v950_v4  ;;  %v940_v16 = vadd.f32 0.05243302, %v939_v10  ;;  %v775_v22 = vadd.f32 %v771_v31, %v722_v61 }
 0x106   : > { %v904_v36 = vadd.f32 1.1283791, %v903_v25 }
 0x107   : > { %1244 = vrcp.f32 %v915_v58  ;;  %v952_v11 = vmul.f32 %v951_v9, %v1591_v46  ;;  %v941_v29 = vmul.f32 %v940_v16, %v1591_v46  ;;  %v927_v34 = vand.u32 2147483648, %v915_v58  ;;  %v884_v10 = vpop.f32.mrf.mxu1 }
 0x108   : > { %v925_v39 = vand.u32 2147483647, %v915_v58  ;;  %vm921_vm11 = vweird.f32 %v915_v58  ;;  %v905_v45 = vmul.f32 %v904_v36, %v1577_v23  ;;  %v842_v8 = vadd.f32 %v838_v5, %v775_v22 }
 0x109   : > { %v953_v15 = vadd.f32 0.4994258, %v952_v11  ;;  %v942_v40 = vadd.f32 0.18741608, %v941_v29  ;;  %v928_v30 = vor.u32 1.1754944e-38, %v927_v34 }
 0x10a   : > { %vm926_vm13 = vcmp.eq.f32.partialorder %v925_v39, 8.507059e+37  ;;  %v888_v2 = vadd.f32 %v884_v10, %v842_v8 }
 0x10b   : > { %v954_v19 = vmul.f32 %v953_v15, %v1591_v46  ;;  %v943_v49 = vmul.f32 %v942_v40, %v1591_v46 }
 0x10d   : > { %v1245_v20 = vpop.eup %1244  ;;  %v955_v28 = vadd.f32 1.0, %v954_v19  ;;  %v944_v57 = vadd.f32 1.1283791, %v943_v49 }
 0x10e   : > { %v917_v26 = vmul.f32 %v1245_v20, %v915_v58  ;;  %vm922_vm10 = vweird.f32 %v1245_v20 }
 0x10f   : > { %1246 = vrcp.f32 %v955_v28  ;;  %vm923_vm12 = vmor %vm921_vm11, %vm922_vm10  ;;  %v967_v56 = vand.u32 2147483648, %v955_v28  ;;  %v965_v59 = vand.u32 2147483647, %v955_v28  ;;  %vm961_vm15 = vweird.f32 %v955_v28 }
 0x110   : > { %v918_v33 = vsub.f32 1.0, %v917_v26  ;;  %v945_v1 = vmul.f32 %v944_v57, %v1584_v38  ;;  %v890_v38 = vmul.f32 0.5, %v1581_v35 }
 0x111   : > { %v968_v0 = vor.u32 1.1754944e-38, %v967_v56  ;;  %vm966_vm1 = vcmp.eq.f32.partialorder %v965_v59, 8.507059e+37 }
 0x112   : > { %v919_v37 = vmul.f32 %v1245_v20, %v918_v33 }
 0x114   : > { %v920_v42 = vadd.f32 %v1245_v20, %v919_v37 }
 0x115   : > { %v1247_v32 = vpop.eup %1246 }
 0x116   : > { %v924_v17 = vsel %vm923_vm12, %v1245_v20, %v920_v42  ;;  %v957_v50 = vmul.f32 %v1247_v32, %v955_v28  ;;  %vm962_vm14 = vweird.f32 %v1247_v32 }
 0x117   : > { %v929_v47 = vsel %vm926_vm13, %v928_v30, %v924_v17  ;;  %vm963_vm0 = vmor %vm961_vm15, %vm962_vm14 }
 0x118   : > { %v930_v51 = vmul.f32 %v929_v47, %v905_v45  ;;  %v958_v41 = vsub.f32 1.0, %v957_v50 }
 0x11a   : > { %v1149_v55 = vclamps-f32 %v930_v51, 1.0  ;;  %v959_v23 = vmul.f32 %v1247_v32, %v958_v41 }
 0x11c   : > { %v973_v46 = vadd.f32 1.0, %v1149_v55  ;;  %v960_v62 = vadd.f32 %v1247_v32, %v959_v23 }
 0x11e   : > { %v975_v63 = vmul.f32 %v973_v46, %v889_v60  ;;  %v964_v3 = vsel %vm963_vm0, %v1247_v32, %v960_v62 }
 0x11f   : > { %v969_v58 = vsel %vm966_vm1, %v968_v0, %v964_v3 }
 0x120   : > { %v977_v4 = vmul.f32 %v975_v63, %v887_v48  ;;  %v970_v7 = vmul.f32 %v969_v58, %v945_v1 }
 0x122   : > { %979 = vst [vmem:[%s314_s16] sm:$0xff] %v977_v4  ;;  %v1150_v9 = vclamps-f32 %v970_v7, 1.0 }
 0x124   : > { %v974_v11 = vadd.f32 1.0, %v1150_v9 }
 0x126   : > { %v976_v12 = vmul.f32 %v974_v11, %v890_v38 }
 0x128   : > { %v978_v14 = vmul.f32 %v976_v12, %v888_v2 }
 0x12a   : > { %980 = vst [vmem:[%s314_s16 + $0x8] sm:$0xff] %v978_v14 }
 0x12b   : > { %1275 = shalt.err (!%p1272_p9)
}
 0x12c   : > { %s1344_s18 = smov 128   ;;  %s1345_s25 = smov 8  }
 0x12d   : > { %1169 = dma.vmem_to_hbm [thread:$0]  (%p1432_p3), %s997_s14, 256, %s999_s27, %s982_s7, %s1344_s18, %s1344_s18, %s1345_s25  }
 0x12e PF: > { %p1175_p10 = scmp.ge.s32.totalorder %s1342_s28, 2  ;;  %s1013_s16 = sand.u32 1, %s1314_s21  }
 0x12f   : > { %s1014_s20 = scalar_lea.sflag [#allocation4], %s1013_s16 }
 0x130   : > { %p1172_p11 = pnand %p1175_p10, %p1441_p8 }
 0x132   : > { %p1173_p12 = pneg %p1172_p11 }
 0x134   : > { %1309 = dma.done.wait (%p1173_p12), %s1014_s20, 256  }
 0x135   : > { %1311 = vsyncadd (%p1173_p12), %s1014_s20, 4294967040  ;;  %s19_s28 = sadd.s32 1, %s1342_s28   ;;  %s1676_s25 = sld [smem:[#allocation6_spill]] }
 0x136   : > { %p16_p13 = scmp.ge.s32.totalorder %s19_s28, 10   ;;  %s1677_s10 = sld [smem:[#allocation7_spill]] }
 0x137   : > { %s1678_s27 = sld [smem:[#allocation8_spill]]  ;;  %s1679_s21 = smov %s1318_s22 }
 0x138   : > { %s1680_s22 = smov %s1322_s23  ;;  %s1681_s23 = smov %s1450_s15 }
 0x139   : > { %s1682_s24 = smov %s1334_s26  ;;  %18 = sbr.rel (!%p16_p13) target bundleno = 5 (0x5), region = 98 }
 0x13c   : > { %s1683_s26 = smov %s1677_s10 }
 0x13e   :  { %1020 = vsyncpa [#allocation4], 1 }
 0x13f   :  { %1022 = vsyncpa [#allocation4 + $0x1], 1 }

</bundles_post_ra>
